<compile_context>
chip_gen: v7x
topology: tpu7x:2x2x1
jax: 0.10.0
libtpu: 0.0.40
codegen_flags: <defaults>
</compile_context>

<pallas_src>
import math

import jax
import jax.numpy as jnp
from jax import lax
from jax.experimental import pallas as pl
from jax.experimental.pallas import tpu as pltpu


# ------------------------------ Pallas kernel ------------------------------ #

def _make_resblock_kernel(H, W, C, ksize, N):
    """Fused conv(+BN folded) -> ReLU -> conv(+BN, res_scale folded) -> +x.
    Activations are (C, N) with N = images_per_chunk * H * W (lane-dense)."""
    assert ksize % 2 == 1, "odd kernel sizes only"
    k = ksize
    r = k // 2

    def kernel(x_ref, m_ref, w1_ref, b1_ref, w2_ref, b2_ref, o_ref, taps_ref):
        x = x_ref[...]                                   # (C, N) f32

        def conv_same(a, w_ref, b_ref):
            # k accumulating MXU matmuls, one per tap-row group (dy); only a
            # (k*C, N) bf16 tap slab is live at any time.
            acc = None
            for g in range(k):                           # dy = g - r
                dy = g - r
                for j in range(k):                       # dx = j - r
                    dx = j - r
                    shift = dy * W + dx
                    s = a if shift == 0 else jnp.roll(a, -shift, axis=1)
                    msk = m_ref[g * k + j: g * k + j + 1, :]   # (1, N) f32
                    # mask in f32 (v5e-safe), cast to bf16 at the store.
                    taps_ref[pl.ds(j * C, C), :] = (s * msk).astype(jnp.bfloat16)
                part = jnp.dot(w_ref[g], taps_ref[...],         # bf16 x bf16
                               preferred_element_type=jnp.float32)
                acc = part if acc is None else acc + part
            return acc + b_ref[...]                      # (C,1) f32 broadcast

        h = jnp.maximum(conv_same(x, w1_ref, b1_ref), 0.0)   # conv1+BN1+ReLU
        y = conv_same(h, w2_ref, b2_ref)                     # conv2+BN2*scale
        o_ref[...] = (y + x).astype(o_ref.dtype)             # residual add

    return kernel


def _make_tap_masks(H, W, images_per_chunk, ksize):
    """(k*k, images_per_chunk*H*W) f32 border masks, tap order (dy, dx)."""
    r = ksize // 2
    HW = H * W
    col = jnp.arange(images_per_chunk * HW, dtype=jnp.int32)
    pix = col % HW
    yy = pix // W
    xx = pix % W
    rows = []
    for dy in range(-r, r + 1):
        for dx in range(-r, r + 1):
            rows.append((yy + dy >= 0) & (yy + dy < H) &
                        (xx + dx >= 0) & (xx + dx < W))
    return jnp.stack(rows, axis=0).astype(jnp.float32)


def resblock_pallas(x_nchw, w1f, b1f, w2f, b2f, ksize, n_chunks):
    B, C, H, W = x_nchw.shape
    HW = H * W
    assert B % n_chunks == 0
    Bc = B // n_chunks
    N = Bc * HW                       # matmul N axis = batch-chunk * spatial
    k = ksize

    # Channel-major, batch folded into lanes (plain-XLA boundary transpose).
    x_cm = jnp.transpose(x_nchw, (1, 0, 2, 3)).reshape(C, B * HW)
    masks = _make_tap_masks(H, W, Bc, k)

    # Explicit scoped-VMEM budget with headroom, clamped to v7x's 64 MiB/TC.
    est = (4 * C * N * 4              # double-buffered x-in + out blocks (f32)
           + k * k * N * 4            # resident tap masks
           + 2 * k * C * k * C * 2    # resident conv weights (bf16)
           + 2 * C * 128 * 4          # biases (lane-padded)
           + k * C * N * 2            # taps scratch (bf16)
           + 6 * C * N * 4)           # live f32 temporaries (x, h, acc, piece)
    vmem_limit = min(max(int(1.3 * est), 16 << 20), 64 << 20)

    kern = _make_resblock_kernel(H, W, C, k, N)
    out_cm = pl.pallas_call(
        kern,
        grid=(n_chunks,),
        in_specs=[
            pl.BlockSpec((C, N), lambda c: (0, c)),            # x chunk
            pl.BlockSpec((k * k, N), lambda c: (0, 0)),        # masks (resident)
            pl.BlockSpec((k, C, k * C), lambda c: (0, 0, 0)),  # w1 (resident)
            pl.BlockSpec((C, 1), lambda c: (0, 0)),            # b1
            pl.BlockSpec((k, C, k * C), lambda c: (0, 0, 0)),  # w2 (resident)
            pl.BlockSpec((C, 1), lambda c: (0, 0)),            # b2
        ],
        out_specs=pl.BlockSpec((C, N), lambda c: (0, c)),
        out_shape=jax.ShapeDtypeStruct((C, B * HW), jnp.float32),
        scratch_shapes=[pltpu.VMEM((k * C, N), jnp.bfloat16)], # tap slab
        compiler_params=pltpu.CompilerParams(
            dimension_semantics=("parallel",),                 # v7x: 2 TCs
            vmem_limit_bytes=vmem_limit),
    )(x_cm, masks, w1f, b1f, w2f, b2f)

    return jnp.transpose(out_cm.reshape(C, B, HW), (1, 0, 2)).reshape(B, C, H, W)


# -------------------------- parameter setup (glue) -------------------------- #

def conv_params(key, cin, cout, kk):
    kw_, kb_ = jax.random.split(key)
    bound = 1.0 / math.sqrt(cin * kk * kk)
    w = jax.random.uniform(kw_, (cout, cin, kk, kk), jnp.float32, -bound, bound)
    b = jax.random.uniform(kb_, (cout,), jnp.float32, -bound, bound)
    return w, b


def bn_params(key, c):
    k1, k2, k3, k4 = jax.random.split(key, 4)
    gamma = jax.random.uniform(k1, (c,), jnp.float32, 0.8, 1.2)
    beta = jax.random.uniform(k2, (c,), jnp.float32, -0.1, 0.1)
    mean = jax.random.uniform(k3, (c,), jnp.float32, -0.1, 0.1)
    var = jax.random.uniform(k4, (c,), jnp.float32, 0.5, 1.5)
    return gamma, beta, mean, var


def fold_bn(w, b, gamma, beta, mean, var, eps=1e-5):
    """Fold inference-mode BatchNorm2d into a (Cout,Cin,kh,kw) conv + bias."""
    scale = gamma / jnp.sqrt(var + eps)
    return w * scale[:, None, None, None], (b - mean) * scale + beta


def flatten_conv_weight(w):
    """(Cout,Cin,kh,kw) -> (kh, Cout, kw*Cin) bf16, dy-group major, Cin minor
    (matches the per-group tap streaming order in the kernel)."""
    cout, cin, kh, kw_ = w.shape
    wt = jnp.transpose(w, (2, 0, 3, 1))            # (kh, Cout, kw, Cin)
    return wt.reshape(kh, cout, kw_ * cin).astype(jnp.bfloat16)


def make_resblock_params(key, n_feat, kernel_size=3, bn=True):
    k1, k2, k3, k4 = jax.random.split(key, 4)
    w1, b1 = conv_params(k1, n_feat, n_feat, kernel_size)
    w2, b2 = conv_params(k2, n_feat, n_feat, kernel_size)
    p = {"w1": w1, "b1": b1, "w2": w2, "b2": b2,
         "bn": bn, "kernel_size": kernel_size}
    if bn:
        p["bn1"] = bn_params(k3, n_feat)
        p["bn2"] = bn_params(k4, n_feat)
    return p


# ------------------------------- forward pass ------------------------------- #

def resblock_forward(x_nchw, params, res_scale=1.0):
    """Pallas forward; matches ResBlock.forward (inference-mode BN)."""
    B = x_nchw.shape[0]
    w1, b1 = params["w1"], params["b1"]
    w2, b2 = params["w2"], params["b2"]
    if params["bn"]:
        w1, b1 = fold_bn(w1, b1, *params["bn1"])
        w2, b2 = fold_bn(w2, b2, *params["bn2"])
    # res = body(x) * res_scale  ->  fold the scale into the second conv.
    w2, b2 = w2 * res_scale, b2 * res_scale
    n_chunks = 2 if (B >= 2 and B % 2 == 0) else 1   # v7x: 2 parallel chunks
    return resblock_pallas(
        x_nchw,
        flatten_conv_weight(w1), b1.reshape(-1, 1).astype(jnp.float32),
        flatten_conv_weight(w2), b2.reshape(-1, 1).astype(jnp.float32),
        params["kernel_size"], n_chunks)


# ---------------------------- pure-JAX reference ---------------------------- #

def resblock_reference(x, params, res_scale=1.0):
    ks = params["kernel_size"]
    pad = ks // 2

    def conv(h, w, b):
        out = lax.conv_general_dilated(
            h, w, window_strides=(1, 1),
            padding=[(pad, pad), (pad, pad)],
            dimension_numbers=("NCHW", "OIHW", "NCHW"),
            precision=lax.Precision.HIGHEST)
        return out + b[None, :, None, None]

    def bnorm(h, stats, eps=1e-5):
        gamma, beta, mean, var = stats
        inv = gamma / jnp.sqrt(var + eps)
        return ((h - mean[None, :, None, None]) * inv[None, :, None, None]
                + beta[None, :, None, None])

    h = conv(x, params["w1"], params["b1"])
    if params["bn"]:
        h = bnorm(h, params["bn1"])
    h = jnp.maximum(h, 0.0)
    h = conv(h, params["w2"], params["b2"])
    if params["bn"]:
        h = bnorm(h, params["bn2"])
    return h * res_scale + x


# ----------------------------------- main ----------------------------------- #

if __name__ == "__main__":
    B, C, H, W = 4, 8, 16, 16          # n_feat=8, kernel_size=3
    root = jax.random.PRNGKey(0)
    k_x, k_p = jax.random.split(root)

    x = jax.random.normal(k_x, (B, C, H, W), jnp.float32)    # NCHW like PyTorch
    params = make_resblock_params(k_p, n_feat=C, kernel_size=3, bn=True)

    out = jax.block_until_ready(resblock_forward(x, params, res_scale=1.0))
    ref = jax.block_until_ready(resblock_reference(x, params, res_scale=1.0))

    max_err = float(jnp.max(jnp.abs(out - ref)))
    assert out.shape == (B, C, H, W)
    # bf16 MXU operands (f32 accumulate) -> tolerance loosened vs f32 reference.
    assert max_err < 5e-2, f"mismatch vs reference: {max_err}"

    print("KERNEL_OK")
</pallas_src>

<mosaic_0001>
module attributes {stable_mosaic.version = 11 : i64} {
  func.func @kernel(%arg0: i32, %arg1: memref<8x512xf32, #tpu.memory_space<vmem>>, %arg2: memref<9x512xf32, #tpu.memory_space<vmem>>, %arg3: memref<3x8x24xbf16, #tpu.memory_space<vmem>>, %arg4: memref<8x1xf32, #tpu.memory_space<vmem>>, %arg5: memref<3x8x24xbf16, #tpu.memory_space<vmem>>, %arg6: memref<8x1xf32, #tpu.memory_space<vmem>>, %arg7: memref<8x512xf32, #tpu.memory_space<vmem>>, %arg8: memref<24x512xbf16, #tpu.memory_space<vmem>>) attributes {dimension_semantics = [#tpu.dimension_semantics<parallel>], iteration_bounds = array<i64: 2>, scalar_prefetch = 0 : i64, scratch_operands = 1 : i64, tpu.core_type = #tpu.core_type<tc>, window_params = [{transform_indices = @transform_0, window_bounds = array<i64: 8, 512>}, {pipeline_mode = #tpu.pipeline_mode<synchronous>, transform_indices = @transform_1, window_bounds = array<i64: 9, 512>}, {pipeline_mode = #tpu.pipeline_mode<synchronous>, transform_indices = @transform_2, window_bounds = array<i64: 3, 8, 24>}, {pipeline_mode = #tpu.pipeline_mode<synchronous>, transform_indices = @transform_3, window_bounds = array<i64: 8, 1>}, {pipeline_mode = #tpu.pipeline_mode<synchronous>, transform_indices = @transform_4, window_bounds = array<i64: 3, 8, 24>}, {pipeline_mode = #tpu.pipeline_mode<synchronous>, transform_indices = @transform_5, window_bounds = array<i64: 8, 1>}, {transform_indices = @transform_6, window_bounds = array<i64: 8, 512>}]} {
    %c0 = arith.constant 0 : index
    %c0_0 = arith.constant 0 : index
    %0 = vector.load %arg1[%c0, %c0_0] : memref<8x512xf32, #tpu.memory_space<vmem>>, vector<8x512xf32>
    %1 = vector.extract_strided_slice %0 {offsets = [0, 495], sizes = [8, 17], strides = [1, 1]} : vector<8x512xf32> to vector<8x17xf32>
    %2 = vector.extract_strided_slice %0 {offsets = [0, 0], sizes = [8, 495], strides = [1, 1]} : vector<8x512xf32> to vector<8x495xf32>
    %3 = tpu.concatenate %1, %2 in 1 : vector<8x17xf32>, vector<8x495xf32> -> vector<8x512xf32>
    %c0_1 = arith.constant 0 : index
    %c0_2 = arith.constant 0 : index
    %4 = vector.load %arg2[%c0_1, %c0_2] : memref<9x512xf32, #tpu.memory_space<vmem>>, vector<1x512xf32>
    %5 = vector.broadcast %4 : vector<1x512xf32> to vector<8x512xf32>
    %6 = arith.mulf %3, %5 : vector<8x512xf32>
    %7 = arith.truncf %6 : vector<8x512xf32> to vector<8x512xbf16>
    %c0_3 = arith.constant 0 : index
    %c0_4 = arith.constant 0 : index
    %8 = vector.load %arg8[%c0_3, %c0_4] : memref<24x512xbf16, #tpu.memory_space<vmem>>, vector<8x512xbf16>
    tpu.vector_store %arg8[%c0_3, %c0_4], %7 {strides = array<i32>} : memref<24x512xbf16, #tpu.memory_space<vmem>>, vector<8x512xbf16>,
    %9 = vector.extract_strided_slice %0 {offsets = [0, 496], sizes = [8, 16], strides = [1, 1]} : vector<8x512xf32> to vector<8x16xf32>
    %10 = vector.extract_strided_slice %0 {offsets = [0, 0], sizes = [8, 496], strides = [1, 1]} : vector<8x512xf32> to vector<8x496xf32>
    %11 = tpu.concatenate %9, %10 in 1 : vector<8x16xf32>, vector<8x496xf32> -> vector<8x512xf32>
    %c1 = arith.constant 1 : index
    %c0_5 = arith.constant 0 : index
    %12 = vector.load %arg2[%c1, %c0_5] : memref<9x512xf32, #tpu.memory_space<vmem>>, vector<1x512xf32>
    %13 = vector.broadcast %12 : vector<1x512xf32> to vector<8x512xf32>
    %14 = arith.mulf %11, %13 : vector<8x512xf32>
    %15 = arith.truncf %14 : vector<8x512xf32> to vector<8x512xbf16>
    %c8 = arith.constant 8 : index
    %c0_6 = arith.constant 0 : index
    %16 = vector.load %arg8[%c8, %c0_6] : memref<24x512xbf16, #tpu.memory_space<vmem>>, vector<8x512xbf16>
    tpu.vector_store %arg8[%c8, %c0_6], %15 {strides = array<i32>} : memref<24x512xbf16, #tpu.memory_space<vmem>>, vector<8x512xbf16>,
    %17 = vector.extract_strided_slice %0 {offsets = [0, 497], sizes = [8, 15], strides = [1, 1]} : vector<8x512xf32> to vector<8x15xf32>
    %18 = vector.extract_strided_slice %0 {offsets = [0, 0], sizes = [8, 497], strides = [1, 1]} : vector<8x512xf32> to vector<8x497xf32>
    %19 = tpu.concatenate %17, %18 in 1 : vector<8x15xf32>, vector<8x497xf32> -> vector<8x512xf32>
    %c2 = arith.constant 2 : index
    %c0_7 = arith.constant 0 : index
    %20 = vector.load %arg2[%c2, %c0_7] : memref<9x512xf32, #tpu.memory_space<vmem>>, vector<1x512xf32>
    %21 = vector.broadcast %20 : vector<1x512xf32> to vector<8x512xf32>
    %22 = arith.mulf %19, %21 : vector<8x512xf32>
    %23 = arith.truncf %22 : vector<8x512xf32> to vector<8x512xbf16>
    %c16 = arith.constant 16 : index
    %c0_8 = arith.constant 0 : index
    %24 = vector.load %arg8[%c16, %c0_8] : memref<24x512xbf16, #tpu.memory_space<vmem>>, vector<8x512xbf16>
    tpu.vector_store %arg8[%c16, %c0_8], %23 {strides = array<i32>} : memref<24x512xbf16, #tpu.memory_space<vmem>>, vector<8x512xbf16>,
    %c0_9 = arith.constant 0 : index
    %c0_10 = arith.constant 0 : index
    %c0_11 = arith.constant 0 : index
    %25 = vector.load %arg3[%c0_9, %c0_10, %c0_11] : memref<3x8x24xbf16, #tpu.memory_space<vmem>>, vector<1x8x24xbf16>
    %26 = vector.shape_cast %25 : vector<1x8x24xbf16> to vector<8x24xbf16>
    %c0_12 = arith.constant 0 : index
    %c0_13 = arith.constant 0 : index
    %27 = vector.load %arg8[%c0_12, %c0_13] : memref<24x512xbf16, #tpu.memory_space<vmem>>, vector<24x512xbf16>
    %cst = arith.constant dense<0.000000e+00> : vector<8x512xf32>
    %28 = tpu.matmul %26, %27, %cst {dimension_numbers = #tpu.dot_dimension_numbers<[1], [0], [0], [1], [0, 0, 1, 1], [], []>} : vector<8x24xbf16>, vector<24x512xbf16>, vector<8x512xf32> -> vector<8x512xf32>
    %29 = vector.extract_strided_slice %0 {offsets = [0, 511], sizes = [8, 1], strides = [1, 1]} : vector<8x512xf32> to vector<8x1xf32>
    %30 = vector.extract_strided_slice %0 {offsets = [0, 0], sizes = [8, 511], strides = [1, 1]} : vector<8x512xf32> to vector<8x511xf32>
    %31 = tpu.concatenate %29, %30 in 1 : vector<8x1xf32>, vector<8x511xf32> -> vector<8x512xf32>
    %c3 = arith.constant 3 : index
    %c0_14 = arith.constant 0 : index
    %32 = vector.load %arg2[%c3, %c0_14] : memref<9x512xf32, #tpu.memory_space<vmem>>, vector<1x512xf32>
    %33 = vector.broadcast %32 : vector<1x512xf32> to vector<8x512xf32>
    %34 = arith.mulf %31, %33 : vector<8x512xf32>
    %35 = arith.truncf %34 : vector<8x512xf32> to vector<8x512xbf16>
    %c0_15 = arith.constant 0 : index
    %c0_16 = arith.constant 0 : index
    %36 = vector.load %arg8[%c0_15, %c0_16] : memref<24x512xbf16, #tpu.memory_space<vmem>>, vector<8x512xbf16>
    tpu.vector_store %arg8[%c0_15, %c0_16], %35 {strides = array<i32>} : memref<24x512xbf16, #tpu.memory_space<vmem>>, vector<8x512xbf16>,
    %c4 = arith.constant 4 : index
    %c0_17 = arith.constant 0 : index
    %37 = vector.load %arg2[%c4, %c0_17] : memref<9x512xf32, #tpu.memory_space<vmem>>, vector<1x512xf32>
    %38 = vector.broadcast %37 : vector<1x512xf32> to vector<8x512xf32>
    %39 = arith.mulf %0, %38 : vector<8x512xf32>
    %40 = arith.truncf %39 : vector<8x512xf32> to vector<8x512xbf16>
    %c8_18 = arith.constant 8 : index
    %c0_19 = arith.constant 0 : index
    %41 = vector.load %arg8[%c8_18, %c0_19] : memref<24x512xbf16, #tpu.memory_space<vmem>>, vector<8x512xbf16>
    tpu.vector_store %arg8[%c8_18, %c0_19], %40 {strides = array<i32>} : memref<24x512xbf16, #tpu.memory_space<vmem>>, vector<8x512xbf16>,
    %42 = vector.extract_strided_slice %0 {offsets = [0, 1], sizes = [8, 511], strides = [1, 1]} : vector<8x512xf32> to vector<8x511xf32>
    %43 = vector.extract_strided_slice %0 {offsets = [0, 0], sizes = [8, 1], strides = [1, 1]} : vector<8x512xf32> to vector<8x1xf32>
    %44 = tpu.concatenate %42, %43 in 1 : vector<8x511xf32>, vector<8x1xf32> -> vector<8x512xf32>
    %c5 = arith.constant 5 : index
    %c0_20 = arith.constant 0 : index
    %45 = vector.load %arg2[%c5, %c0_20] : memref<9x512xf32, #tpu.memory_space<vmem>>, vector<1x512xf32>
    %46 = vector.broadcast %45 : vector<1x512xf32> to vector<8x512xf32>
    %47 = arith.mulf %44, %46 : vector<8x512xf32>
    %48 = arith.truncf %47 : vector<8x512xf32> to vector<8x512xbf16>
    %c16_21 = arith.constant 16 : index
    %c0_22 = arith.constant 0 : index
    %49 = vector.load %arg8[%c16_21, %c0_22] : memref<24x512xbf16, #tpu.memory_space<vmem>>, vector<8x512xbf16>
    tpu.vector_store %arg8[%c16_21, %c0_22], %48 {strides = array<i32>} : memref<24x512xbf16, #tpu.memory_space<vmem>>, vector<8x512xbf16>,
    %c1_23 = arith.constant 1 : index
    %c0_24 = arith.constant 0 : index
    %c0_25 = arith.constant 0 : index
    %50 = vector.load %arg3[%c1_23, %c0_24, %c0_25] : memref<3x8x24xbf16, #tpu.memory_space<vmem>>, vector<1x8x24xbf16>
    %51 = vector.shape_cast %50 : vector<1x8x24xbf16> to vector<8x24xbf16>
    %c0_26 = arith.constant 0 : index
    %c0_27 = arith.constant 0 : index
    %52 = vector.load %arg8[%c0_26, %c0_27] : memref<24x512xbf16, #tpu.memory_space<vmem>>, vector<24x512xbf16>
    %cst_28 = arith.constant dense<0.000000e+00> : vector<8x512xf32>
    %53 = tpu.matmul %51, %52, %cst_28 {dimension_numbers = #tpu.dot_dimension_numbers<[1], [0], [0], [1], [0, 0, 1, 1], [], []>} : vector<8x24xbf16>, vector<24x512xbf16>, vector<8x512xf32> -> vector<8x512xf32>
    %54 = arith.addf %28, %53 : vector<8x512xf32>
    %55 = vector.extract_strided_slice %0 {offsets = [0, 15], sizes = [8, 497], strides = [1, 1]} : vector<8x512xf32> to vector<8x497xf32>
    %56 = vector.extract_strided_slice %0 {offsets = [0, 0], sizes = [8, 15], strides = [1, 1]} : vector<8x512xf32> to vector<8x15xf32>
    %57 = tpu.concatenate %55, %56 in 1 : vector<8x497xf32>, vector<8x15xf32> -> vector<8x512xf32>
    %c6 = arith.constant 6 : index
    %c0_29 = arith.constant 0 : index
    %58 = vector.load %arg2[%c6, %c0_29] : memref<9x512xf32, #tpu.memory_space<vmem>>, vector<1x512xf32>
    %59 = vector.broadcast %58 : vector<1x512xf32> to vector<8x512xf32>
    %60 = arith.mulf %57, %59 : vector<8x512xf32>
    %61 = arith.truncf %60 : vector<8x512xf32> to vector<8x512xbf16>
    %c0_30 = arith.constant 0 : index
    %c0_31 = arith.constant 0 : index
    %62 = vector.load %arg8[%c0_30, %c0_31] : memref<24x512xbf16, #tpu.memory_space<vmem>>, vector<8x512xbf16>
    tpu.vector_store %arg8[%c0_30, %c0_31], %61 {strides = array<i32>} : memref<24x512xbf16, #tpu.memory_space<vmem>>, vector<8x512xbf16>,
    %63 = vector.extract_strided_slice %0 {offsets = [0, 16], sizes = [8, 496], strides = [1, 1]} : vector<8x512xf32> to vector<8x496xf32>
    %64 = vector.extract_strided_slice %0 {offsets = [0, 0], sizes = [8, 16], strides = [1, 1]} : vector<8x512xf32> to vector<8x16xf32>
    %65 = tpu.concatenate %63, %64 in 1 : vector<8x496xf32>, vector<8x16xf32> -> vector<8x512xf32>
    %c7 = arith.constant 7 : index
    %c0_32 = arith.constant 0 : index
    %66 = vector.load %arg2[%c7, %c0_32] : memref<9x512xf32, #tpu.memory_space<vmem>>, vector<1x512xf32>
    %67 = vector.broadcast %66 : vector<1x512xf32> to vector<8x512xf32>
    %68 = arith.mulf %65, %67 : vector<8x512xf32>
    %69 = arith.truncf %68 : vector<8x512xf32> to vector<8x512xbf16>
    %c8_33 = arith.constant 8 : index
    %c0_34 = arith.constant 0 : index
    %70 = vector.load %arg8[%c8_33, %c0_34] : memref<24x512xbf16, #tpu.memory_space<vmem>>, vector<8x512xbf16>
    tpu.vector_store %arg8[%c8_33, %c0_34], %69 {strides = array<i32>} : memref<24x512xbf16, #tpu.memory_space<vmem>>, vector<8x512xbf16>,
    %71 = vector.extract_strided_slice %0 {offsets = [0, 17], sizes = [8, 495], strides = [1, 1]} : vector<8x512xf32> to vector<8x495xf32>
    %72 = vector.extract_strided_slice %0 {offsets = [0, 0], sizes = [8, 17], strides = [1, 1]} : vector<8x512xf32> to vector<8x17xf32>
    %73 = tpu.concatenate %71, %72 in 1 : vector<8x495xf32>, vector<8x17xf32> -> vector<8x512xf32>
    %c8_35 = arith.constant 8 : index
    %c0_36 = arith.constant 0 : index
    %74 = vector.load %arg2[%c8_35, %c0_36] : memref<9x512xf32, #tpu.memory_space<vmem>>, vector<1x512xf32>
    %75 = vector.broadcast %74 : vector<1x512xf32> to vector<8x512xf32>
    %76 = arith.mulf %73, %75 : vector<8x512xf32>
    %77 = arith.truncf %76 : vector<8x512xf32> to vector<8x512xbf16>
    %c16_37 = arith.constant 16 : index
    %c0_38 = arith.constant 0 : index
    %78 = vector.load %arg8[%c16_37, %c0_38] : memref<24x512xbf16, #tpu.memory_space<vmem>>, vector<8x512xbf16>
    tpu.vector_store %arg8[%c16_37, %c0_38], %77 {strides = array<i32>} : memref<24x512xbf16, #tpu.memory_space<vmem>>, vector<8x512xbf16>,
    %c2_39 = arith.constant 2 : index
    %c0_40 = arith.constant 0 : index
    %c0_41 = arith.constant 0 : index
    %79 = vector.load %arg3[%c2_39, %c0_40, %c0_41] : memref<3x8x24xbf16, #tpu.memory_space<vmem>>, vector<1x8x24xbf16>
    %80 = vector.shape_cast %79 : vector<1x8x24xbf16> to vector<8x24xbf16>
    %c0_42 = arith.constant 0 : index
    %c0_43 = arith.constant 0 : index
    %81 = vector.load %arg8[%c0_42, %c0_43] : memref<24x512xbf16, #tpu.memory_space<vmem>>, vector<24x512xbf16>
    %cst_44 = arith.constant dense<0.000000e+00> : vector<8x512xf32>
    %82 = tpu.matmul %80, %81, %cst_44 {dimension_numbers = #tpu.dot_dimension_numbers<[1], [0], [0], [1], [0, 0, 1, 1], [], []>} : vector<8x24xbf16>, vector<24x512xbf16>, vector<8x512xf32> -> vector<8x512xf32>
    %83 = arith.addf %54, %82 : vector<8x512xf32>
    %c0_45 = arith.constant 0 : index
    %c0_46 = arith.constant 0 : index
    %84 = vector.load %arg4[%c0_45, %c0_46] : memref<8x1xf32, #tpu.memory_space<vmem>>, vector<8x1xf32>
    %85 = vector.broadcast %84 : vector<8x1xf32> to vector<8x512xf32>
    %86 = arith.addf %83, %85 : vector<8x512xf32>
    %cst_47 = arith.constant 0.000000e+00 : f32
    %87 = vector.broadcast %cst_47 : f32 to vector<8x512xf32>
    %88 = arith.maximumf %86, %87 : vector<8x512xf32>
    %89 = vector.extract_strided_slice %88 {offsets = [0, 495], sizes = [8, 17], strides = [1, 1]} : vector<8x512xf32> to vector<8x17xf32>
    %90 = vector.extract_strided_slice %88 {offsets = [0, 0], sizes = [8, 495], strides = [1, 1]} : vector<8x512xf32> to vector<8x495xf32>
    %91 = tpu.concatenate %89, %90 in 1 : vector<8x17xf32>, vector<8x495xf32> -> vector<8x512xf32>
    %c0_48 = arith.constant 0 : index
    %c0_49 = arith.constant 0 : index
    %92 = vector.load %arg2[%c0_48, %c0_49] : memref<9x512xf32, #tpu.memory_space<vmem>>, vector<1x512xf32>
    %93 = vector.broadcast %92 : vector<1x512xf32> to vector<8x512xf32>
    %94 = arith.mulf %91, %93 : vector<8x512xf32>
    %95 = arith.truncf %94 : vector<8x512xf32> to vector<8x512xbf16>
    %c0_50 = arith.constant 0 : index
    %c0_51 = arith.constant 0 : index
    %96 = vector.load %arg8[%c0_50, %c0_51] : memref<24x512xbf16, #tpu.memory_space<vmem>>, vector<8x512xbf16>
    tpu.vector_store %arg8[%c0_50, %c0_51], %95 {strides = array<i32>} : memref<24x512xbf16, #tpu.memory_space<vmem>>, vector<8x512xbf16>,
    %97 = vector.extract_strided_slice %88 {offsets = [0, 496], sizes = [8, 16], strides = [1, 1]} : vector<8x512xf32> to vector<8x16xf32>
    %98 = vector.extract_strided_slice %88 {offsets = [0, 0], sizes = [8, 496], strides = [1, 1]} : vector<8x512xf32> to vector<8x496xf32>
    %99 = tpu.concatenate %97, %98 in 1 : vector<8x16xf32>, vector<8x496xf32> -> vector<8x512xf32>
    %c1_52 = arith.constant 1 : index
    %c0_53 = arith.constant 0 : index
    %100 = vector.load %arg2[%c1_52, %c0_53] : memref<9x512xf32, #tpu.memory_space<vmem>>, vector<1x512xf32>
    %101 = vector.broadcast %100 : vector<1x512xf32> to vector<8x512xf32>
    %102 = arith.mulf %99, %101 : vector<8x512xf32>
    %103 = arith.truncf %102 : vector<8x512xf32> to vector<8x512xbf16>
    %c8_54 = arith.constant 8 : index
    %c0_55 = arith.constant 0 : index
    %104 = vector.load %arg8[%c8_54, %c0_55] : memref<24x512xbf16, #tpu.memory_space<vmem>>, vector<8x512xbf16>
    tpu.vector_store %arg8[%c8_54, %c0_55], %103 {strides = array<i32>} : memref<24x512xbf16, #tpu.memory_space<vmem>>, vector<8x512xbf16>,
    %105 = vector.extract_strided_slice %88 {offsets = [0, 497], sizes = [8, 15], strides = [1, 1]} : vector<8x512xf32> to vector<8x15xf32>
    %106 = vector.extract_strided_slice %88 {offsets = [0, 0], sizes = [8, 497], strides = [1, 1]} : vector<8x512xf32> to vector<8x497xf32>
    %107 = tpu.concatenate %105, %106 in 1 : vector<8x15xf32>, vector<8x497xf32> -> vector<8x512xf32>
    %c2_56 = arith.constant 2 : index
    %c0_57 = arith.constant 0 : index
    %108 = vector.load %arg2[%c2_56, %c0_57] : memref<9x512xf32, #tpu.memory_space<vmem>>, vector<1x512xf32>
    %109 = vector.broadcast %108 : vector<1x512xf32> to vector<8x512xf32>
    %110 = arith.mulf %107, %109 : vector<8x512xf32>
    %111 = arith.truncf %110 : vector<8x512xf32> to vector<8x512xbf16>
    %c16_58 = arith.constant 16 : index
    %c0_59 = arith.constant 0 : index
    %112 = vector.load %arg8[%c16_58, %c0_59] : memref<24x512xbf16, #tpu.memory_space<vmem>>, vector<8x512xbf16>
    tpu.vector_store %arg8[%c16_58, %c0_59], %111 {strides = array<i32>} : memref<24x512xbf16, #tpu.memory_space<vmem>>, vector<8x512xbf16>,
    %c0_60 = arith.constant 0 : index
    %c0_61 = arith.constant 0 : index
    %c0_62 = arith.constant 0 : index
    %113 = vector.load %arg5[%c0_60, %c0_61, %c0_62] : memref<3x8x24xbf16, #tpu.memory_space<vmem>>, vector<1x8x24xbf16>
    %114 = vector.shape_cast %113 : vector<1x8x24xbf16> to vector<8x24xbf16>
    %c0_63 = arith.constant 0 : index
    %c0_64 = arith.constant 0 : index
    %115 = vector.load %arg8[%c0_63, %c0_64] : memref<24x512xbf16, #tpu.memory_space<vmem>>, vector<24x512xbf16>
    %cst_65 = arith.constant dense<0.000000e+00> : vector<8x512xf32>
    %116 = tpu.matmul %114, %115, %cst_65 {dimension_numbers = #tpu.dot_dimension_numbers<[1], [0], [0], [1], [0, 0, 1, 1], [], []>} : vector<8x24xbf16>, vector<24x512xbf16>, vector<8x512xf32> -> vector<8x512xf32>
    %117 = vector.extract_strided_slice %88 {offsets = [0, 511], sizes = [8, 1], strides = [1, 1]} : vector<8x512xf32> to vector<8x1xf32>
    %118 = vector.extract_strided_slice %88 {offsets = [0, 0], sizes = [8, 511], strides = [1, 1]} : vector<8x512xf32> to vector<8x511xf32>
    %119 = tpu.concatenate %117, %118 in 1 : vector<8x1xf32>, vector<8x511xf32> -> vector<8x512xf32>
    %c3_66 = arith.constant 3 : index
    %c0_67 = arith.constant 0 : index
    %120 = vector.load %arg2[%c3_66, %c0_67] : memref<9x512xf32, #tpu.memory_space<vmem>>, vector<1x512xf32>
    %121 = vector.broadcast %120 : vector<1x512xf32> to vector<8x512xf32>
    %122 = arith.mulf %119, %121 : vector<8x512xf32>
    %123 = arith.truncf %122 : vector<8x512xf32> to vector<8x512xbf16>
    %c0_68 = arith.constant 0 : index
    %c0_69 = arith.constant 0 : index
    %124 = vector.load %arg8[%c0_68, %c0_69] : memref<24x512xbf16, #tpu.memory_space<vmem>>, vector<8x512xbf16>
    tpu.vector_store %arg8[%c0_68, %c0_69], %123 {strides = array<i32>} : memref<24x512xbf16, #tpu.memory_space<vmem>>, vector<8x512xbf16>,
    %c4_70 = arith.constant 4 : index
    %c0_71 = arith.constant 0 : index
    %125 = vector.load %arg2[%c4_70, %c0_71] : memref<9x512xf32, #tpu.memory_space<vmem>>, vector<1x512xf32>
    %126 = vector.broadcast %125 : vector<1x512xf32> to vector<8x512xf32>
    %127 = arith.mulf %88, %126 : vector<8x512xf32>
    %128 = arith.truncf %127 : vector<8x512xf32> to vector<8x512xbf16>
    %c8_72 = arith.constant 8 : index
    %c0_73 = arith.constant 0 : index
    %129 = vector.load %arg8[%c8_72, %c0_73] : memref<24x512xbf16, #tpu.memory_space<vmem>>, vector<8x512xbf16>
    tpu.vector_store %arg8[%c8_72, %c0_73], %128 {strides = array<i32>} : memref<24x512xbf16, #tpu.memory_space<vmem>>, vector<8x512xbf16>,
    %130 = vector.extract_strided_slice %88 {offsets = [0, 1], sizes = [8, 511], strides = [1, 1]} : vector<8x512xf32> to vector<8x511xf32>
    %131 = vector.extract_strided_slice %88 {offsets = [0, 0], sizes = [8, 1], strides = [1, 1]} : vector<8x512xf32> to vector<8x1xf32>
    %132 = tpu.concatenate %130, %131 in 1 : vector<8x511xf32>, vector<8x1xf32> -> vector<8x512xf32>
    %c5_74 = arith.constant 5 : index
    %c0_75 = arith.constant 0 : index
    %133 = vector.load %arg2[%c5_74, %c0_75] : memref<9x512xf32, #tpu.memory_space<vmem>>, vector<1x512xf32>
    %134 = vector.broadcast %133 : vector<1x512xf32> to vector<8x512xf32>
    %135 = arith.mulf %132, %134 : vector<8x512xf32>
    %136 = arith.truncf %135 : vector<8x512xf32> to vector<8x512xbf16>
    %c16_76 = arith.constant 16 : index
    %c0_77 = arith.constant 0 : index
    %137 = vector.load %arg8[%c16_76, %c0_77] : memref<24x512xbf16, #tpu.memory_space<vmem>>, vector<8x512xbf16>
    tpu.vector_store %arg8[%c16_76, %c0_77], %136 {strides = array<i32>} : memref<24x512xbf16, #tpu.memory_space<vmem>>, vector<8x512xbf16>,
    %c1_78 = arith.constant 1 : index
    %c0_79 = arith.constant 0 : index
    %c0_80 = arith.constant 0 : index
    %138 = vector.load %arg5[%c1_78, %c0_79, %c0_80] : memref<3x8x24xbf16, #tpu.memory_space<vmem>>, vector<1x8x24xbf16>
    %139 = vector.shape_cast %138 : vector<1x8x24xbf16> to vector<8x24xbf16>
    %c0_81 = arith.constant 0 : index
    %c0_82 = arith.constant 0 : index
    %140 = vector.load %arg8[%c0_81, %c0_82] : memref<24x512xbf16, #tpu.memory_space<vmem>>, vector<24x512xbf16>
    %cst_83 = arith.constant dense<0.000000e+00> : vector<8x512xf32>
    %141 = tpu.matmul %139, %140, %cst_83 {dimension_numbers = #tpu.dot_dimension_numbers<[1], [0], [0], [1], [0, 0, 1, 1], [], []>} : vector<8x24xbf16>, vector<24x512xbf16>, vector<8x512xf32> -> vector<8x512xf32>
    %142 = arith.addf %116, %141 : vector<8x512xf32>
    %143 = vector.extract_strided_slice %88 {offsets = [0, 15], sizes = [8, 497], strides = [1, 1]} : vector<8x512xf32> to vector<8x497xf32>
    %144 = vector.extract_strided_slice %88 {offsets = [0, 0], sizes = [8, 15], strides = [1, 1]} : vector<8x512xf32> to vector<8x15xf32>
    %145 = tpu.concatenate %143, %144 in 1 : vector<8x497xf32>, vector<8x15xf32> -> vector<8x512xf32>
    %c6_84 = arith.constant 6 : index
    %c0_85 = arith.constant 0 : index
    %146 = vector.load %arg2[%c6_84, %c0_85] : memref<9x512xf32, #tpu.memory_space<vmem>>, vector<1x512xf32>
    %147 = vector.broadcast %146 : vector<1x512xf32> to vector<8x512xf32>
    %148 = arith.mulf %145, %147 : vector<8x512xf32>
    %149 = arith.truncf %148 : vector<8x512xf32> to vector<8x512xbf16>
    %c0_86 = arith.constant 0 : index
    %c0_87 = arith.constant 0 : index
    %150 = vector.load %arg8[%c0_86, %c0_87] : memref<24x512xbf16, #tpu.memory_space<vmem>>, vector<8x512xbf16>
    tpu.vector_store %arg8[%c0_86, %c0_87], %149 {strides = array<i32>} : memref<24x512xbf16, #tpu.memory_space<vmem>>, vector<8x512xbf16>,
    %151 = vector.extract_strided_slice %88 {offsets = [0, 16], sizes = [8, 496], strides = [1, 1]} : vector<8x512xf32> to vector<8x496xf32>
    %152 = vector.extract_strided_slice %88 {offsets = [0, 0], sizes = [8, 16], strides = [1, 1]} : vector<8x512xf32> to vector<8x16xf32>
    %153 = tpu.concatenate %151, %152 in 1 : vector<8x496xf32>, vector<8x16xf32> -> vector<8x512xf32>
    %c7_88 = arith.constant 7 : index
    %c0_89 = arith.constant 0 : index
    %154 = vector.load %arg2[%c7_88, %c0_89] : memref<9x512xf32, #tpu.memory_space<vmem>>, vector<1x512xf32>
    %155 = vector.broadcast %154 : vector<1x512xf32> to vector<8x512xf32>
    %156 = arith.mulf %153, %155 : vector<8x512xf32>
    %157 = arith.truncf %156 : vector<8x512xf32> to vector<8x512xbf16>
    %c8_90 = arith.constant 8 : index
    %c0_91 = arith.constant 0 : index
    %158 = vector.load %arg8[%c8_90, %c0_91] : memref<24x512xbf16, #tpu.memory_space<vmem>>, vector<8x512xbf16>
    tpu.vector_store %arg8[%c8_90, %c0_91], %157 {strides = array<i32>} : memref<24x512xbf16, #tpu.memory_space<vmem>>, vector<8x512xbf16>,
    %159 = vector.extract_strided_slice %88 {offsets = [0, 17], sizes = [8, 495], strides = [1, 1]} : vector<8x512xf32> to vector<8x495xf32>
    %160 = vector.extract_strided_slice %88 {offsets = [0, 0], sizes = [8, 17], strides = [1, 1]} : vector<8x512xf32> to vector<8x17xf32>
    %161 = tpu.concatenate %159, %160 in 1 : vector<8x495xf32>, vector<8x17xf32> -> vector<8x512xf32>
    %c8_92 = arith.constant 8 : index
    %c0_93 = arith.constant 0 : index
    %162 = vector.load %arg2[%c8_92, %c0_93] : memref<9x512xf32, #tpu.memory_space<vmem>>, vector<1x512xf32>
    %163 = vector.broadcast %162 : vector<1x512xf32> to vector<8x512xf32>
    %164 = arith.mulf %161, %163 : vector<8x512xf32>
    %165 = arith.truncf %164 : vector<8x512xf32> to vector<8x512xbf16>
    %c16_94 = arith.constant 16 : index
    %c0_95 = arith.constant 0 : index
    %166 = vector.load %arg8[%c16_94, %c0_95] : memref<24x512xbf16, #tpu.memory_space<vmem>>, vector<8x512xbf16>
    tpu.vector_store %arg8[%c16_94, %c0_95], %165 {strides = array<i32>} : memref<24x512xbf16, #tpu.memory_space<vmem>>, vector<8x512xbf16>,
    %c2_96 = arith.constant 2 : index
    %c0_97 = arith.constant 0 : index
    %c0_98 = arith.constant 0 : index
    %167 = vector.load %arg5[%c2_96, %c0_97, %c0_98] : memref<3x8x24xbf16, #tpu.memory_space<vmem>>, vector<1x8x24xbf16>
    %168 = vector.shape_cast %167 : vector<1x8x24xbf16> to vector<8x24xbf16>
    %c0_99 = arith.constant 0 : index
    %c0_100 = arith.constant 0 : index
    %169 = vector.load %arg8[%c0_99, %c0_100] : memref<24x512xbf16, #tpu.memory_space<vmem>>, vector<24x512xbf16>
    %cst_101 = arith.constant dense<0.000000e+00> : vector<8x512xf32>
    %170 = tpu.matmul %168, %169, %cst_101 {dimension_numbers = #tpu.dot_dimension_numbers<[1], [0], [0], [1], [0, 0, 1, 1], [], []>} : vector<8x24xbf16>, vector<24x512xbf16>, vector<8x512xf32> -> vector<8x512xf32>
    %171 = arith.addf %142, %170 : vector<8x512xf32>
    %c0_102 = arith.constant 0 : index
    %c0_103 = arith.constant 0 : index
    %172 = vector.load %arg6[%c0_102, %c0_103] : memref<8x1xf32, #tpu.memory_space<vmem>>, vector<8x1xf32>
    %173 = vector.broadcast %172 : vector<8x1xf32> to vector<8x512xf32>
    %174 = arith.addf %171, %173 : vector<8x512xf32>
    %175 = arith.addf %174, %0 : vector<8x512xf32>
    %c0_104 = arith.constant 0 : index
    %c0_105 = arith.constant 0 : index
    %176 = vector.load %arg7[%c0_104, %c0_105] : memref<8x512xf32, #tpu.memory_space<vmem>>, vector<8x512xf32>
    tpu.vector_store %arg7[%c0_104, %c0_105], %175 {strides = array<i32>} : memref<8x512xf32, #tpu.memory_space<vmem>>, vector<8x512xf32>,
    return
  }
  func.func @transform_0(%arg0: i32) -> (i32, i32) {
    %c0_i32 = arith.constant 0 : i32
    %c0_i32_0 = arith.constant 0 : i32
    return %c0_i32, %arg0 : i32, i32
  }
  func.func @transform_1(%arg0: i32) -> (i32, i32) {
    %c0_i32 = arith.constant 0 : i32
    %c0_i32_0 = arith.constant 0 : i32
    %c0_i32_1 = arith.constant 0 : i32
    return %c0_i32, %c0_i32_0 : i32, i32
  }
  func.func @transform_2(%arg0: i32) -> (i32, i32, i32) {
    %c0_i32 = arith.constant 0 : i32
    %c0_i32_0 = arith.constant 0 : i32
    %c0_i32_1 = arith.constant 0 : i32
    %c0_i32_2 = arith.constant 0 : i32
    return %c0_i32, %c0_i32_0, %c0_i32_1 : i32, i32, i32
  }
  func.func @transform_3(%arg0: i32) -> (i32, i32) {
    %c0_i32 = arith.constant 0 : i32
    %c0_i32_0 = arith.constant 0 : i32
    %c0_i32_1 = arith.constant 0 : i32
    return %c0_i32, %c0_i32_0 : i32, i32
  }
  func.func @transform_4(%arg0: i32) -> (i32, i32, i32) {
    %c0_i32 = arith.constant 0 : i32
    %c0_i32_0 = arith.constant 0 : i32
    %c0_i32_1 = arith.constant 0 : i32
    %c0_i32_2 = arith.constant 0 : i32
    return %c0_i32, %c0_i32_0, %c0_i32_1 : i32, i32, i32
  }
  func.func @transform_5(%arg0: i32) -> (i32, i32) {
    %c0_i32 = arith.constant 0 : i32
    %c0_i32_0 = arith.constant 0 : i32
    %c0_i32_1 = arith.constant 0 : i32
    return %c0_i32, %c0_i32_0 : i32, i32
  }
  func.func @transform_6(%arg0: i32) -> (i32, i32) {
    %c0_i32 = arith.constant 0 : i32
    %c0_i32_0 = arith.constant 0 : i32
    return %c0_i32, %arg0 : i32, i32
  }
}

</mosaic_0001>

<bundles_post_ra>
// kernel: tpu_custom_call.1
= control target key start
LH: loop header
LB: loop body
LE: loop exit
PB: predicated region body
PF: predicated region fallthrough
CT: control target
= control target key end

     0   :  { %11 = vsyncpa [#allocation4], 0  ;;  %s3444_s0 = inlined_call_operand.hbm [shape: f32[8,1024], index: 0, kind: input, shape index: {}]   ;;  %s3445_s1 = inlined_call_operand.hbm [shape: f32[9,512], index: 1, kind: input, shape index: {}]   ;;  %s3446_s2 = inlined_call_operand.vmem [shape: bf16[3,8,24], index: 2, kind: input, shape index: {}]   ;;  %s3447_s3 = inlined_call_operand.vmem [shape: f32[8,1], index: 3, kind: input, shape index: {}]   ;;  %s3448_s4 = inlined_call_operand.vmem [shape: bf16[3,8,24], index: 4, kind: input, shape index: {}]   ;;  %s3449_s5 = inlined_call_operand.vmem [shape: f32[8,1], index: 5, kind: input, shape index: {}]   ;;  %s3450_s6 = inlined_call_operand.hbm [shape: f32[8,1024], index: 6, kind: output, shape index: {}]  }
   0x1   :  { %13 = vsyncpa [#allocation4 + $0x1], 0 }
   0x2   :  { %14 = vsyncpa [#allocation7], 0 }
   0x3   :  { %15 = vsyncpa [#allocation5], 0 }
   0x4   :  { %17 = vsyncpa [#allocation5 + $0x1], 0  ;;  %s2789_s21 = smov 0   ;;  %s2791_s22 = smov 0  }
   0x5   :  { %s2793_s23 = smov 0   ;;  %s2795_s24 = smov 0  }
   0x6 LB: > { %s2810_s25 = sadd.s32 4294967295, %s2738_s24   ;;  %s2323_s26 = sadd.s32 4294967294, %s2738_s24   ;;  %s2738_s24 = sphi %s2795_s24, %s3470_s24   ;;  %s2734_s23 = sphi %s2793_s23, %s3469_s23   ;;  %s2730_s22 = sphi %s2791_s22, %s3468_s22   ;;  %s2726_s21 = sphi %s2789_s21, %s3467_s21  }
   0x7   : > { %p43_p0 = scmp.ne.s32.totalorder %s2730_s22, %s2726_s21  ;;  %p3451_p1 = scmp.eq.s32.totalorder %s2810_s25, 0 }
   0x8   : > { %p178_p3 = scmp.eq.s32.totalorder %s2323_s26, 1  ;;  %p2324_p5 = scmp.ge.s32.totalorder %s2738_s24, 1 }
   0x9   : > { %p2819_p4 = por %p3451_p1, %p43_p0  ;;  %p185_p7 = scmp.lt.s32.totalorder %s2738_s24, 3 }
   0xa   : > { %p2824_p6 = por %p178_p3, %p43_p0  ;;  %s2740_s30 = smov [#allocation6]  }
   0xb   : > { %s3454_s27 = scalar_select %p2819_p4, 1, 0 }
   0xc   : > { %s3455_s28 = scalar_select %p2824_p6, 1, 0 }
   0xd   : > { %p2829_p8 = pnand %p2324_p5, %p185_p7  ;;  %s197_s7 = sshll.u32 %s2740_s30, 4  ;;  %s2833_s7 = int_to_ptr.vmem [resolvable:$true] %s197_s7 }
   0xe   : > { %s2845_s9 = sadd.s32 1, %s2738_s24   ;;  %s30_s10 = sadd.s32 1, %s2734_s23 }
   0xf   : > { %s3456_s29 = scalar_select %p2829_p8, 1, 0 }
  0x10   : > { %p2545_p9 = pneg %p2829_p8  ;;  %s27_s11 = ssub.s32 %s2738_s24, %s2845_s9 }
  0x11   : > { %s2610_s14 = scalar_lea.hbm %s3445_s1, 1024 }
  0x12   : > { %p2840_p11 = pnand %p2545_p9, %p3451_p1  ;;  %p2611_p12 = scmp.ne.s32.totalorder %s3445_s1, %s2610_s14 }
  0x13   : > { %p2617_p5 = scmp.lt.u32.totalorder %s2610_s14, %s3445_s1 }
  0x14   : > { %p2612_p13 = pneg %p2840_p11 }
  0x16   : > { %p2613_p0 = pnand %p2612_p13, %p2611_p12 }
  0x18   : > { %p2614_p3 = pneg %p2613_p0 }
  0x1a   : > { %p2619_p7 = pnand %p2617_p5, %p2614_p3 }
  0x1c   : > { %2622 = shalt.err (!%p2619_p7)
}
  0x1d   : > { %s2623_s19 = scalar_lea.vmem %s2833_s7, 1024  ;;  %p2631_p2 = scmp.lt.s32.totalorder %s2833_s7, %s2833_s7 }
  0x1e   : > { %p2624_p9 = scmp.ne.s32.totalorder %s2833_s7, %s2623_s19  ;;  %p2632_p6 = scmp.lt.s32.totalorder %s2623_s19, %s2623_s19 }
  0x20   : > { %p2626_p10 = pnand %p2624_p9, %p2612_p13  ;;  %p2633_p4 = por %p2632_p6, %p2631_p2 }
  0x22   : > { %p2627_p1 = pneg %p2626_p10 }
  0x24   : > { %p2634_p8 = pnand %p2633_p4, %p2627_p1 }
  0x26   : > { %2637 = shalt.err (!%p2634_p8)
}
  0x27   : > { %s2741_s20 = smov 512   ;;  %s2742_s26 = smov 32  }
  0x28   : > { %2548 = dma.hbm_to_vmem [thread:$0]  (!%p2840_p11), %s3445_s1, 1024, %s2833_s7, [#allocation7], %s2741_s20, %s2741_s20, %s2742_s26  }
  0x29   : > { %p28_p2 = scmp.eq.s32.totalorder %s27_s11, 0  ;;  %p37_p1 = scmp.ne.s32.totalorder %s2734_s23, %s2730_s22 }
  0x2a   : > { %p38_p4 = scmp.eq.s32.totalorder %s2738_s24, 0  ;;  %p2558_p6 = scmp.lt.s32.totalorder %s2738_s24, 2 }
  0x2b   : > { %s2876_s13 = scalar_select %p28_p2, %s2734_s23, %s30_s10  }
  0x2c   : > { %p39_p8 = por %p38_p4, %p37_p1  ;;  %p3458_p10 = scmp.eq.s32.totalorder %s2810_s25, 1 }
  0x2d   : > { %s223_s15 = sand.u32 1, %s2734_s23   ;;  %s2451_s16 = sshll.u32 %s2738_s24, 9 }
  0x2e   : > { %p2880_p12 = por %p3458_p10, %p37_p1  ;;  %s2327_s17 = sshll.u32 %s223_s15, 5 }
  0x2f   : > { %s2889_s19 = scalar_lea.hbm %s3444_s0, %s2451_s16  ;;  %s227_s7 = scalar_lea.vmem [#allocation3], %s2327_s17 }
  0x30   : > { %s235_s10 = sshll.u32 %s227_s7, 4  ;;  %p2891_p11 = pnand %p2558_p6, %p39_p8  ;;  %s2895_s10 = int_to_ptr.vmem [resolvable:$true] %s235_s10 }
  0x31   : > { %s224_s20 = scalar_lea.sflag [#allocation4], %s223_s15  ;;  %s2638_s26 = scalar_lea.hbm %s2889_s19, 512 }
  0x32   : > { %p2639_p13 = scmp.ne.s32.totalorder %s2889_s19, %s2638_s26  ;;  %p2640_p0 = pneg %p2891_p11 }
  0x33   : > { %s2643_s16 = scalar_lea.hbm %s3444_s0, 1024  ;;  %p2644_p7 = scmp.lt.u32.totalorder %s2889_s19, %s3444_s0 }
  0x34   : > { %p2641_p3 = pnand %p2640_p0, %p2639_p13  ;;  %p2645_p9 = scmp.lt.u32.totalorder %s2643_s16, %s2638_s26 }
  0x35   : > { %p2647_p1 = scmp.lt.u32.totalorder %s2638_s26, %s2889_s19 }
  0x36   : > { %p2642_p5 = pneg %p2641_p3  ;;  %p2646_p2 = por %p2645_p9, %p2644_p7 }
  0x38   : > { %p2648_p4 = por %p2647_p1, %p2646_p2 }
  0x3a   : > { %p2649_p6 = pnand %p2648_p4, %p2642_p5 }
  0x3c   : > { %2652 = shalt.err (!%p2649_p6)
}
  0x3d   : > { %s2653_s15 = scalar_lea.vmem %s2895_s10, 512  ;;  %s2743_s18 = smov [#allocation3]  }
  0x3e   : > { %p2654_p8 = scmp.ne.s32.totalorder %s2895_s10, %s2653_s15  ;;  %s2658_s7 = sshll.u32 %s2743_s18, 4  ;;  %s2659_s7 = int_to_ptr.vmem [resolvable:$false] %s2658_s7 }
  0x3f   : > { %s2660_s30 = scalar_lea.vmem %s2659_s7, 1024  ;;  %p2661_p3 = scmp.lt.s32.totalorder %s2895_s10, %s2659_s7 }
  0x40   : > { %p2656_p10 = pnand %p2654_p8, %p2640_p0  ;;  %p2662_p7 = scmp.lt.s32.totalorder %s2660_s30, %s2653_s15 }
  0x42   : > { %p2657_p13 = pneg %p2656_p10  ;;  %p2663_p9 = por %p2662_p7, %p2661_p3 }
  0x44   : > { %p2664_p2 = pnand %p2663_p9, %p2657_p13 }
  0x46   : > { %2667 = shalt.err (!%p2664_p2)
}
  0x47   : > { %2552 = dma.hbm_to_vmem [thread:$0]  (!%p2891_p11), %s2889_s19, 512, %s2895_s10, %s224_s20  }
  0x48   : > { %p3461_p5 = scmp.ne.s32.totalorder %s3456_s29, 0 }
  0x49   : > { %s2925_s26 = sand.u32 (!%p3461_p5), 1, %s2730_s22   ;;  %p3462_p0 = scmp.ne.s32.totalorder (!%p3461_p5), %s3454_s27, 0 }
  0x4a   : > { %244 = sbr.rel (%p3461_p5) target bundleno = 909 (0x38d), region = 44  ;;  %s2331_s12 = sshll.u32 (!%p3461_p5), %s2925_s26, 5 }
  0x4b   : > { %s247_s16 = scalar_lea.sflag (!%p3461_p5), [#allocation4], %s2925_s26  ;;  %s2931_s17 = scalar_lea.vmem (!%p3461_p5), [#allocation3], %s2331_s12 }
  0x51   : > { %2713 = dma.done.wait (%p3462_p0), %s247_s16, 512  }
  0x52   : > { %2715 = vsyncadd (%p3462_p0), %s247_s16, 4294966784  ;;  %p3463_p11 = scmp.eq.s32.totalorder %s2810_s25, 0 }
  0x54   : > { %2717 = dma.done.wait (%p3463_p11), [#allocation7], 1024   ;;  %p3464_p1 = pmov %p3463_p11 }
  0x55   : > { %v2942_v0 = vld [vmem:[%s2931_s17 + $0x18] sm:$0xff]  ;;  %v2945_v1 = vld [vmem:[%s2931_s17 + $0x8] sm:$0xff]  ;;  %s2744_s29 = smov 1   ;;  %v2952_v2 = vld [vmem:[%s2931_s17 + $0x10] sm:$0xff]  ;;  %s2745_s27 = smov 127   ;;  %v2747_v4 = vmov 0   ;;  %v314_v6 = vlaneseq }
  0x56   : > { %2719 = vsyncadd (%p3464_p1), [#allocation7], 4294966272  ;;  %489 = vrot.lane.b32.xlu0 %v2942_v0, %s2744_s29  ;;  %494 = vrot.lane.b32.xlu1 %v2945_v1, %s2744_s29  ;;  %v2955_v3 = vld [vmem:[%s2931_s17] sm:$0xff]  ;;  %s2746_s19 = smov 17   ;;  %s2748_s10 = smov 16   ;;  %vm498_vm0 = vcmask 7168  }
  0x57   : > { %747 = vmatprep.mubr.bf16.mxu0 %v2747_v4  ;;  %788 = vmatprep.mubr.bf16.mxu1 %v2747_v4  ;;  %s2749_s11 = smov 15   ;;  %s2750_s20 = smov 113   ;;  %v1252_v5 = vld [vmem:[%s3447_s3] sm:$0xff]  ;;  %v315_v7 = vshrl.u32 %v314_v6, 7  ;;  %vm605_vm1 = vcmask 1039360   ;;  %vm702_vm2 = vcmask 1043456  }
  0x58   : > { %2605 = vset.pattern.permute.xlu0 %v2747_v4  ;;  %s2751_s8 = smov 112   ;;  %s2752_s15 = smov 111   ;;  %v553_v12 = vld [vmem:[#allocation6 + $0x4] ss:$8 sm:$0xf]  ;;  %vm698_vm3 = vcmask 195584  }
  0x59   : > { %v3023_v8 = vsub.s32 2, %v315_v7  ;;  %v3025_v9 = vsub.s32 0, %v315_v7  ;;  %v3027_v10 = vsub.s32 1, %v315_v7  ;;  %v3029_v11 = vsub.s32 3, %v315_v7  ;;  %s282_s18 = scalar_lea.vmem [#allocation8], %s2331_s12  ;;  %s2488_s7 = sshll.u32 %s2810_s25, 9 }
  0x5a   : > { %496 = vrot.lane.b32.xlu1 %v2952_v2, %s2744_s29  ;;  %492 = vrot.lane.b32.xlu0 %v2955_v3, %s2744_s29  ;;  %v508_v13 = vld [vmem:[#allocation6 + $0x3] ss:$8 sm:$0xf]  ;;  %v616_v16 = vld [vmem:[#allocation6 + $0x5] ss:$8 sm:$0xf] }
  0x5b   : > { %v562_v17 = vrot.slane %v553_v12, %v3027_v10  ;;  %v570_v18 = vrot.slane %v553_v12, %v3029_v11  ;;  %v558_v19 = vrot.slane %v553_v12, %v3025_v9  ;;  %v566_v20 = vrot.slane %v553_v12, %v3023_v8  ;;  %v375_v7 = vld [vmem:[#allocation6 + $0x1] ss:$8 sm:$0xf]  ;;  %v312_v12 = vld [vmem:[#allocation6] ss:$8 sm:$0xf] }
  0x5c   : > { %v521_v21 = vrot.slane %v508_v13, %v3023_v8  ;;  %v513_v22 = vrot.slane %v508_v13, %v3025_v9  ;;  %v517_v23 = vrot.slane %v508_v13, %v3027_v10  ;;  %v525_v24 = vrot.slane %v508_v13, %v3029_v11  ;;  %s2243_s30 = sshll.u32 %s282_s18, 4  ;;  %s2229_s25 = scalar_lea.sflag [#allocation5], %s2925_s26  ;;  %s3402_s30 = int_to_ptr.vmem [resolvable:$true] %s2243_s30 }
  0x5d   : > { %v621_v25 = vrot.slane %v616_v16, %v3025_v9  ;;  %v576_v28 = vmul.f32 %v562_v17, %v2945_v1  ;;  %v578_v29 = vmul.f32 %v570_v18, %v2942_v0  ;;  %v575_v30 = vmul.f32 %v558_v19, %v2955_v3  ;;  %s2668_s12 = scalar_lea.vmem %s3402_s30, 512 }
  0x5e   : > { %599 = vrot.lane.b32.xlu1 %v2945_v1, %s2745_s27  ;;  %597 = vrot.lane.b32.xlu0 %v2955_v3, %s2745_s27  ;;  %v577_v31 = vmul.f32 %v566_v20, %v2952_v2  ;;  %v633_v47 = vrot.slane %v616_v16, %v3029_v11  ;;  %v625_v49 = vrot.slane %v616_v16, %v3027_v10  ;;  %vm365_vm4 = vcmask 130048   ;;  %p2669_p4 = scmp.ne.s32.totalorder %s3402_s30, %s2668_s12 }
  0x5f   : > { %v629_v50 = vrot.slane %v616_v16, %v3023_v8  ;;  %vm303_vm5 = vcmask 138240   ;;  %v329_v13 = vrot.slane %v312_v12, %v3029_v11  ;;  %v325_v18 = vrot.slane %v312_v12, %v3023_v8 }
  0x60   : > { %v380_v20 = vrot.slane %v375_v7, %v3025_v9  ;;  %vm428_vm6 = vcmask 121856   ;;  %vm995_vm7 = vcmask 916480   ;;  %vm932_vm8 = vcmask 924672   ;;  %p2670_p6 = pnand %p2669_p4, %p2880_p12 }
  0x61   : > { %vm1058_vm9 = vcmask 908288  }
  0x62   : > { %603 = vrot.lane.b32.xlu1 %v2942_v0, %s2745_s27  ;;  %601 = vrot.lane.b32.xlu0 %v2952_v2, %s2745_s27  ;;  %p2671_p8 = pneg %p2670_p6 }
  0x66   : > { %297 = vrot.lane.b32.xlu1 %v2955_v3, %s2746_s19  ;;  %291 = vrot.lane.b32.xlu0 %v2942_v0, %s2746_s19 }
  0x6a   : > { %301 = vrot.lane.b32.xlu1 %v2952_v2, %s2746_s19  ;;  %299 = vrot.lane.b32.xlu0 %v2945_v1, %s2746_s19 }
  0x6e   : > { %359 = vrot.lane.b32.xlu1 %v2955_v3, %s2748_s10  ;;  %356 = vrot.lane.b32.xlu0 %v2942_v0, %s2748_s10 }
  0x72   : > { %363 = vrot.lane.b32.xlu1 %v2952_v2, %s2748_s10  ;;  %361 = vrot.lane.b32.xlu0 %v2945_v1, %s2748_s10 }
  0x76   : > { %422 = vrot.lane.b32.xlu1 %v2955_v3, %s2749_s11  ;;  %419 = vrot.lane.b32.xlu0 %v2942_v0, %s2749_s11 }
  0x7a   : > { %426 = vrot.lane.b32.xlu1 %v2952_v2, %s2749_s11  ;;  %424 = vrot.lane.b32.xlu0 %v2945_v1, %s2749_s11 }
  0x7e   : > { %926 = vrot.lane.b32.xlu1 %v2945_v1, %s2750_s20  ;;  %924 = vrot.lane.b32.xlu0 %v2955_v3, %s2750_s20 }
  0x82   : > { %930 = vrot.lane.b32.xlu1 %v2942_v0, %s2750_s20  ;;  %928 = vrot.lane.b32.xlu0 %v2952_v2, %s2750_s20 }
  0x86   : > { %989 = vrot.lane.b32.xlu1 %v2945_v1, %s2751_s8  ;;  %987 = vrot.lane.b32.xlu0 %v2955_v3, %s2751_s8 }
  0x8a   : > { %993 = vrot.lane.b32.xlu1 %v2942_v0, %s2751_s8  ;;  %991 = vrot.lane.b32.xlu0 %v2952_v2, %s2751_s8 }
  0x8e   : > { %1052 = vrot.lane.b32.xlu1 %v2945_v1, %s2752_s15  ;;  %1050 = vrot.lane.b32.xlu0 %v2955_v3, %s2752_s15  ;;  %v2346_v3 = vld [vmem:[%s3446_s2 + $0x4] sm:$0xf] }
  0x92   : > { %1056 = vrot.lane.b32.xlu1 %v2942_v0, %s2752_s15  ;;  %1054 = vrot.lane.b32.xlu0 %v2952_v2, %s2752_s15 }
  0x96   : > { %1255 = vperm.xlu0 %2605, %v1252_v5  }
  0xc8   : > { %v490_v14 = vpop.permute.xlu0 %489  ;;  %v495_v15 = vpop.permute.xlu1 %494 }
  0xcc   : > { %v497_v26 = vpop.permute.xlu1 %496  ;;  %v493_v27 = vpop.permute.xlu0 %492 }
  0xcd   : > { %v500_v32 = vsel %vm498_vm0, %v495_v15, %v497_v26  ;;  %v501_v33 = vsel %vm498_vm0, %v497_v26, %v490_v14  ;;  %v499_v34 = vsel %vm498_vm0, %v493_v27, %v495_v15  ;;  %v506_v35 = vsel %vm498_vm0, %v490_v14, %v493_v27 }
  0xce   : > { %v532_v36 = vmul.f32 %v521_v21, %v500_v32  ;;  %v530_v37 = vmul.f32 %v513_v22, %v506_v35  ;;  %v531_v38 = vmul.f32 %v517_v23, %v499_v34  ;;  %v533_v39 = vmul.f32 %v525_v24, %v501_v33  ;;  %v438_v21 = vld [vmem:[#allocation6 + $0x2] ss:$8 sm:$0xf] }
  0xcf   : > { %v321_v14 = vrot.slane %v312_v12, %v3027_v10  ;;  %v392_v23 = vrot.slane %v375_v7, %v3029_v11  ;;  %v384_v24 = vrot.slane %v375_v7, %v3027_v10  ;;  %v317_v26 = vrot.slane %v312_v12, %v3025_v9 }
  0xd0   : > { %v600_v40 = vpop.permute.xlu1 %599  ;;  %v598_v41 = vpop.permute.xlu0 %597  ;;  %v2490_v42 = vpack.c.bf16 %v576_v28, %v531_v38  ;;  %v2492_v43 = vpack.c.bf16 %v578_v29, %v533_v39  ;;  %v2489_v44 = vpack.c.bf16 %v575_v30, %v530_v37  ;;  %v2491_v45 = vpack.c.bf16 %v577_v31, %v532_v36 }
  0xd1   : > { %v606_v46 = vsel %vm605_vm1, %v598_v41, %v600_v40  ;;  %v443_v33 = vrot.slane %v438_v21, %v3025_v9 }
  0xd2   : > { %v638_v48 = vmul.f32 %v621_v25, %v606_v46  ;;  %715 = vmatprep.subr.bf16.mxu0 %v2490_v42  ;;  %756 = vmatprep.subr.bf16.mxu1 %v2492_v43  ;;  %v388_v25 = vrot.slane %v375_v7, %v3023_v8  ;;  %v482_v7 = vld [vmem:[%s3446_s2] sm:$0xf] }
  0xd3   : > { %716 = vmatpush1.bf16.msra.mxu0 %v2489_v44  ;;  %757 = vmatpush1.bf16.msra.mxu1 %v2491_v45 }
  0xd4   : > { %v604_v51 = vpop.permute.xlu1 %603  ;;  %v602_v52 = vpop.permute.xlu0 %601  ;;  %v2493_v56 = vpack.c.bf16 %v638_v48, %v638_v48 }
  0xd5   : > { %v614_v53 = vsel %vm605_vm1, %v604_v51, %v598_v41  ;;  %v607_v54 = vsel %vm605_vm1, %v600_v40, %v602_v52  ;;  %v608_v55 = vsel %vm605_vm1, %v602_v52, %v604_v51  ;;  %v447_v52 = vrot.slane %v438_v21, %v3027_v10 }
  0xd6   : > { %v641_v57 = vmul.f32 %v633_v47, %v614_v53  ;;  %v639_v58 = vmul.f32 %v625_v49, %v607_v54  ;;  %v640_v59 = vmul.f32 %v629_v50, %v608_v55  ;;  %v704_v1 = vsel %vm702_vm2, %v2493_v56, 0 }
  0xd7   : > { %v455_v50 = vrot.slane %v438_v21, %v3029_v11  ;;  %v451_v53 = vrot.slane %v438_v21, %v3023_v8 }
  0xd8   : > { %v2496_v60 = vpack.c.bf16 %v641_v57, %v641_v57  ;;  %v2494_v61 = vpack.c.bf16 %v639_v58, %v639_v58  ;;  %v2495_v62 = vpack.c.bf16 %v640_v59, %v640_v59  ;;  %v298_v63 = vpop.permute.xlu1 %297  ;;  %v292_v0 = vpop.permute.xlu0 %291 }
  0xd9   : > { %v311_v28 = vsel %vm303_vm5, %v292_v0, %v298_v63 }
  0xda   : > { %2355 = vmatprep.subr.msk.bf16.mxu0 %vm702_vm2, %v2494_v61  ;;  %2357 = vmatprep.subr.msk.bf16.mxu1 %vm702_vm2, %v2496_v60  ;;  %v710_v2 = vsel %vm702_vm2, %v2495_v62, 0  ;;  %v334_v42 = vmul.f32 %v317_v26, %v311_v28 }
  0xdb   : > { %718 = vmatpush1.bf16.msra.mxu0 %v704_v1  ;;  %759 = vmatpush1.bf16.msra.mxu1 %v710_v2 }
  0xdc   : > { %v302_v5 = vpop.permute.xlu1 %301  ;;  %v300_v6 = vpop.permute.xlu0 %299 }
  0xdd   : > { %v306_v17 = vsel %vm303_vm5, %v302_v5, %v292_v0  ;;  %v304_v19 = vsel %vm303_vm5, %v298_v63, %v300_v6  ;;  %v305_v27 = vsel %vm303_vm5, %v300_v6, %v302_v5 }
  0xde   : > { %2356 = vmatmul.mubr.msk.bf16.vlgmr.msra.gmra.mrb[0].mxu0 %vm698_vm3, %v2346_v3  ;;  %2358 = vmatmul.mubr.msk.bf16.vlgmr.msra.gmra.mrb[0].mxu1 %vm698_vm3, %v2346_v3  ;;  %v337_v29 = vmul.f32 %v329_v13, %v306_v17  ;;  %v335_v30 = vmul.f32 %v321_v14, %v304_v19  ;;  %v336_v38 = vmul.f32 %v325_v18, %v305_v27  ;;  %v1006_v14 = vld [vmem:[#allocation6 + $0x7] ss:$8 sm:$0xf] }
  0xdf   : > { %874 = vmatprep.mubr.bf16.mxu0 %v2747_v4  ;;  %915 = vmatprep.mubr.bf16.mxu1 %v2747_v4  ;;  %v1023_v26 = vrot.slane %v1006_v14, %v3029_v11  ;;  %v1015_v27 = vrot.slane %v1006_v14, %v3027_v10  ;;  %v1019_v28 = vrot.slane %v1006_v14, %v3023_v8 }
  0xe0   : > { %v360_v15 = vpop.permute.xlu1 %359  ;;  %v357_v16 = vpop.permute.xlu0 %356 }
  0xe1   : > { %v373_v22 = vsel %vm365_vm4, %v357_v16, %v360_v15 }
  0xe2   : > { %v397_v34 = vmul.f32 %v380_v20, %v373_v22 }
  0xe4   : > { %v364_v31 = vpop.permute.xlu1 %363  ;;  %v362_v32 = vpop.permute.xlu0 %361  ;;  %v2497_v48 = vpack.c.bf16 %v397_v34, %v334_v42 }
  0xe5   : > { %v368_v35 = vsel %vm365_vm4, %v364_v31, %v357_v16  ;;  %v366_v36 = vsel %vm365_vm4, %v360_v15, %v362_v32  ;;  %v367_v37 = vsel %vm365_vm4, %v362_v32, %v364_v31  ;;  %v943_v15 = vld [vmem:[#allocation6 + $0x6] ss:$8 sm:$0xf] }
  0xe6   : > { %v400_v39 = vmul.f32 %v392_v23, %v368_v35  ;;  %v398_v40 = vmul.f32 %v384_v24, %v366_v36  ;;  %v399_v41 = vmul.f32 %v388_v25, %v367_v37  ;;  %v960_v16 = vrot.slane %v943_v15, %v3029_v11  ;;  %v1069_v24 = vld [vmem:[#allocation6 + $0x20] ss:$8 sm:$0xf] }
  0xe7   : > { %v952_v17 = vrot.slane %v943_v15, %v3027_v10  ;;  %v956_v21 = vrot.slane %v943_v15, %v3023_v8  ;;  %v1011_v23 = vrot.slane %v1006_v14, %v3025_v9  ;;  %v1074_v36 = vrot.slane %v1069_v24, %v3025_v9 }
  0xe8   : > { %v2499_v43 = vpack.c.bf16 %v399_v41, %v336_v38  ;;  %v423_v44 = vpop.permute.xlu1 %422  ;;  %v420_v45 = vpop.permute.xlu0 %419  ;;  %v2498_v46 = vpack.c.bf16 %v398_v40, %v335_v30  ;;  %v2500_v47 = vpack.c.bf16 %v400_v39, %v337_v29  ;;  %v948_v29 = vrot.slane %v943_v15, %v3025_v9 }
  0xe9   : > { %v436_v49 = vsel %vm428_vm6, %v420_v45, %v423_v44 }
  0xea   : > { %v460_v51 = vmul.f32 %v443_v33, %v436_v49  ;;  %842 = vmatprep.subr.bf16.mxu0 %v2498_v46  ;;  %883 = vmatprep.subr.bf16.mxu1 %v2500_v47 }
  0xeb   : > { %843 = vmatpush1.bf16.msra.mxu0 %v2497_v48  ;;  %884 = vmatpush1.bf16.msra.mxu1 %v2499_v43 }
  0xec   : > { %v427_v54 = vpop.permute.xlu1 %426  ;;  %v425_v55 = vpop.permute.xlu0 %424  ;;  %v2501_v59 = vpack.c.bf16 %v460_v51, %v460_v51 }
  0xed   : > { %v431_v56 = vsel %vm428_vm6, %v427_v54, %v420_v45  ;;  %v429_v57 = vsel %vm428_vm6, %v423_v44, %v425_v55  ;;  %v430_v58 = vsel %vm428_vm6, %v425_v55, %v427_v54  ;;  %v1078_v55 = vrot.slane %v1069_v24, %v3027_v10 }
  0xee   : > { %v463_v60 = vmul.f32 %v455_v50, %v431_v56  ;;  %v461_v61 = vmul.f32 %v447_v52, %v429_v57  ;;  %v462_v62 = vmul.f32 %v451_v53, %v430_v58  ;;  %v831_v5 = vsel %vm702_vm2, %v2501_v59, 0 }
  0xef   : > { %v1086_v53 = vrot.slane %v1069_v24, %v3029_v11  ;;  %v1082_v56 = vrot.slane %v1069_v24, %v3023_v8 }
  0xf0   : > { %v2504_v63 = vpack.c.bf16 %v463_v60, %v463_v60  ;;  %v2502_v0 = vpack.c.bf16 %v461_v61, %v461_v61  ;;  %v2503_v1 = vpack.c.bf16 %v462_v62, %v462_v62  ;;  %v927_v2 = vpop.permute.xlu1 %926  ;;  %v925_v3 = vpop.permute.xlu0 %924 }
  0xf1   : > { %v933_v31 = vsel %vm932_vm8, %v925_v3, %v927_v2 }
  0xf2   : > { %2367 = vmatprep.subr.msk.bf16.mxu0 %vm702_vm2, %v2502_v0  ;;  %2369 = vmatprep.subr.msk.bf16.mxu1 %vm702_vm2, %v2504_v63  ;;  %v837_v6 = vsel %vm702_vm2, %v2503_v1, 0  ;;  %v965_v45 = vmul.f32 %v948_v29, %v933_v31 }
  0xf3   : > { %845 = vmatpush1.bf16.msra.mxu0 %v831_v5  ;;  %886 = vmatpush1.bf16.msra.mxu1 %v837_v6 }
  0xf4   : > { %v931_v12 = vpop.permute.xlu1 %930  ;;  %v929_v13 = vpop.permute.xlu0 %928 }
  0xf5   : > { %v941_v20 = vsel %vm932_vm8, %v931_v12, %v925_v3  ;;  %v934_v22 = vsel %vm932_vm8, %v927_v2, %v929_v13  ;;  %v935_v30 = vsel %vm932_vm8, %v929_v13, %v931_v12  ;;  %v2377_v12 = vld [vmem:[%s3446_s2 + $0x8] sm:$0xf] }
  0xf6   : > { %2368 = vmatmul.mubr.msk.bf16.vlgmr.msra.gmra.mrb[4].mxu0 %vm698_vm3, %v482_v7  ;;  %2370 = vmatmul.mubr.msk.bf16.vlgmr.msra.gmra.mrb[4].mxu1 %vm698_vm3, %v482_v7  ;;  %v968_v32 = vmul.f32 %v960_v16, %v941_v20  ;;  %v966_v33 = vmul.f32 %v952_v17, %v934_v22  ;;  %v967_v41 = vmul.f32 %v956_v21, %v935_v30 }
  0xf7   : > { %1198 = vmatprep.mubr.bf16.mxu0 %v2747_v4  ;;  %1239 = vmatprep.mubr.bf16.mxu1 %v2747_v4 }
  0xf8   : > { %v990_v18 = vpop.permute.xlu1 %989  ;;  %v988_v19 = vpop.permute.xlu0 %987 }
  0xf9   : > { %v996_v25 = vsel %vm995_vm7, %v988_v19, %v990_v18 }
  0xfa   : > { %v1028_v37 = vmul.f32 %v1011_v23, %v996_v25 }
  0xfc   : > { %v994_v34 = vpop.permute.xlu1 %993  ;;  %v992_v35 = vpop.permute.xlu0 %991  ;;  %v2505_v51 = vpack.c.bf16 %v1028_v37, %v965_v45 }
  0xfd   : > { %v1004_v38 = vsel %vm995_vm7, %v994_v34, %v988_v19  ;;  %v997_v39 = vsel %vm995_vm7, %v990_v18, %v992_v35  ;;  %v998_v40 = vsel %vm995_vm7, %v992_v35, %v994_v34 }
  0xfe   : > { %v1031_v42 = vmul.f32 %v1023_v26, %v1004_v38  ;;  %v1029_v43 = vmul.f32 %v1015_v27, %v997_v39  ;;  %v1030_v44 = vmul.f32 %v1019_v28, %v998_v40 }
 0x100   : > { %v2507_v46 = vpack.c.bf16 %v1030_v44, %v967_v41  ;;  %v1053_v47 = vpop.permute.xlu1 %1052  ;;  %v1051_v48 = vpop.permute.xlu0 %1050  ;;  %v2506_v49 = vpack.c.bf16 %v1029_v43, %v966_v33  ;;  %v2508_v50 = vpack.c.bf16 %v1031_v42, %v968_v32 }
 0x101   : > { %v1059_v52 = vsel %vm1058_vm9, %v1051_v48, %v1053_v47 }
 0x102   : > { %v1091_v54 = vmul.f32 %v1074_v36, %v1059_v52  ;;  %1166 = vmatprep.subr.bf16.mxu0 %v2506_v49  ;;  %1207 = vmatprep.subr.bf16.mxu1 %v2508_v50 }
 0x103   : > { %1167 = vmatpush1.bf16.msra.mxu0 %v2505_v51  ;;  %1208 = vmatpush1.bf16.msra.mxu1 %v2507_v46 }
 0x104   : > { %v1057_v57 = vpop.permute.xlu1 %1056  ;;  %v1055_v58 = vpop.permute.xlu0 %1054  ;;  %v2509_v62 = vpack.c.bf16 %v1091_v54, %v1091_v54  ;;  %v2210_v54 = vld [vmem:[%s3449_s5] sm:$0xff] }
 0x105   : > { %v1067_v59 = vsel %vm1058_vm9, %v1057_v57, %v1051_v48  ;;  %v1060_v60 = vsel %vm1058_vm9, %v1053_v47, %v1055_v58  ;;  %v1061_v61 = vsel %vm1058_vm9, %v1055_v58, %v1057_v57 }
 0x106   : > { %v1094_v63 = vmul.f32 %v1086_v53, %v1067_v59  ;;  %v1092_v0 = vmul.f32 %v1078_v55, %v1060_v60  ;;  %v1093_v1 = vmul.f32 %v1082_v56, %v1061_v61  ;;  %v1155_v6 = vsel %vm702_vm2, %v2509_v62, 0 }
 0x108   : > { %v2512_v2 = vpack.c.bf16 %v1094_v63, %v1094_v63  ;;  %v2510_v3 = vpack.c.bf16 %v1092_v0, %v1092_v0  ;;  %v2511_v5 = vpack.c.bf16 %v1093_v1, %v1093_v1  ;;  %v1477_v1 = vld [vmem:[#allocation6 + $0x3] ss:$8 sm:$0xf] }
 0x10a   : > { %2386 = vmatprep.subr.msk.bf16.mxu0 %vm702_vm2, %v2510_v3  ;;  %2388 = vmatprep.subr.msk.bf16.mxu1 %vm702_vm2, %v2512_v2  ;;  %v1161_v7 = vsel %vm702_vm2, %v2511_v5, 0  ;;  %v1521_v2 = vld [vmem:[#allocation6 + $0x4] ss:$8 sm:$0xf] }
 0x10b   : > { %1169 = vmatpush1.bf16.msra.mxu0 %v1155_v6  ;;  %1210 = vmatpush1.bf16.msra.mxu1 %v1161_v7  ;;  %v1486_v6 = vrot.slane %v1477_v1, %v3027_v10  ;;  %v1530_v7 = vrot.slane %v1521_v2, %v3027_v10 }
 0x10e   : > { %2387 = vmatmul.mubr.msk.bf16.vlgmr.msra.gmra.mrb[8].mxu0 %vm698_vm3, %v2377_v12  ;;  %2389 = vmatmul.mubr.msk.bf16.vlgmr.msra.gmra.mrb[8].mxu1 %vm698_vm3, %v2377_v12 }
 0x10f   : > { %1711 = vmatprep.mubr.bf16.mxu0 %v2747_v4  ;;  %1752 = vmatprep.mubr.bf16.mxu1 %v2747_v4 }
 0x115   : > { %v1256_v33 = vpop.permute.xlu0 %1255 }
 0x1b1   : > { %v749_v13 = vpop.f32.mrb[0].mxu0  ;;  %v790_v14 = vpop.f32.mrb[0].mxu1 }
 0x1b2   : > { %v751_v15 = vpop.f32.mrb[1].mxu0  ;;  %v792_v16 = vpop.f32.mrb[1].mxu1 }
 0x1b3   : > { %v753_v17 = vpop.f32.mrb[2].mxu0  ;;  %v794_v18 = vpop.f32.mrb[2].mxu1 }
 0x1b4   : > { %v754_v19 = vpop.f32.mrb[3].mxu0  ;;  %v795_v20 = vpop.f32.mrb[3].mxu1  ;;  %v1534_v17 = vrot.slane %v1521_v2, %v3023_v8  ;;  %v1526_v18 = vrot.slane %v1521_v2, %v3025_v9 }
 0x1c9   : > { %v876_v21 = vpop.f32.mrb[4].mxu0  ;;  %v917_v22 = vpop.f32.mrb[4].mxu1 }
 0x1ca   : > { %v877_v23 = vadd.f32 %v876_v21, %v749_v13  ;;  %v878_v24 = vpop.f32.mrb[5].mxu0  ;;  %v918_v25 = vadd.f32 %v917_v22, %v790_v14  ;;  %v919_v26 = vpop.f32.mrb[5].mxu1  ;;  %v1538_v22 = vrot.slane %v1521_v2, %v3029_v11 }
 0x1cb   : > { %v879_v27 = vadd.f32 %v878_v24, %v751_v15  ;;  %v920_v28 = vadd.f32 %v919_v26, %v792_v16  ;;  %v880_v29 = vpop.f32.mrb[6].mxu0  ;;  %v921_v30 = vpop.f32.mrb[6].mxu1  ;;  %v1490_v24 = vrot.slane %v1477_v1, %v3023_v8  ;;  %v1494_v26 = vrot.slane %v1477_v1, %v3029_v11 }
 0x1cc   : > { %v881_v31 = vpop.f32.mrb[7].mxu0  ;;  %v922_v32 = vpop.f32.mrb[7].mxu1 }
 0x1e1   : > { %v1200_v34 = vpop.f32.mrb[8].mxu0  ;;  %v1241_v35 = vpop.f32.mrb[8].mxu1 }
 0x1e2   : > { %v1248_v36 = vadd.f32 %v1200_v34, %v877_v23  ;;  %v1250_v37 = vadd.f32 %v1241_v35, %v918_v25  ;;  %v1202_v38 = vpop.f32.mrb[9].mxu0  ;;  %v1243_v39 = vpop.f32.mrb[9].mxu1  ;;  %v3231_v23 = vld [vmem:[#allocation6] ss:$8 sm:$0xf]  ;;  %v1482_v25 = vrot.slane %v1477_v1, %v3025_v9 }
 0x1e3   : > { %v1249_v40 = vadd.f32 %v1202_v38, %v879_v27  ;;  %v1251_v41 = vadd.f32 %v1243_v39, %v920_v28  ;;  %v1204_v42 = vpop.f32.mrb[10].mxu0  ;;  %v1245_v43 = vpop.f32.mrb[10].mxu1  ;;  %v1582_v27 = vld [vmem:[#allocation6 + $0x5] ss:$8 sm:$0xf]  ;;  %v1292_v31 = vrot.slane %v3231_v23, %v3025_v9  ;;  %v1304_v32 = vrot.slane %v3231_v23, %v3029_v11 }
 0x1e4   : > { %v1258_v44 = vadd.f32 %v1256_v33, %v1248_v36  ;;  %v1205_v45 = vpop.f32.mrb[11].mxu0  ;;  %v1246_v46 = vpop.f32.mrb[11].mxu1  ;;  %v1260_v47 = vadd.f32 %v1256_v33, %v1250_v37  ;;  %v3245_v36 = vld [vmem:[#allocation6 + $0x1] ss:$8 sm:$0xf]  ;;  %v1300_v38 = vrot.slane %v3231_v23, %v3023_v8 }
 0x1e5   : > { %v1259_v50 = vadd.f32 %v1256_v33, %v1249_v40  ;;  %v1261_v51 = vadd.f32 %v1256_v33, %v1251_v41  ;;  %v1296_v33 = vrot.slane %v3231_v23, %v3027_v10  ;;  %v1587_v41 = vrot.slane %v1582_v27, %v3025_v9  ;;  %v3254_v46 = vld [vmem:[#allocation6 + $0x2] ss:$8 sm:$0xf]  ;;  %v3266_v1 = vld [vmem:[#allocation6 + $0x6] ss:$8 sm:$0xf] }
 0x1e6   : > { %v3136_v48 = vmax.f32 %v1258_v44, 0.0  ;;  %v3142_v49 = vmax.f32 %v1260_v47, 0.0  ;;  %v1591_v45 = vrot.slane %v1582_v27, %v3027_v10  ;;  %v1353_v47 = vrot.slane %v3245_v36, %v3025_v9 }
 0x1e7   : > { %v1263_v52 = vmax.f32 %v1259_v50, 0.0  ;;  %v3167_v53 = vmax.f32 %v1261_v51, 0.0  ;;  %v1361_v50 = vrot.slane %v3245_v36, %v3023_v8 }
 0x1e8   : > { %1565 = vrot.lane.b32.xlu0 %v3136_v48, %s2745_s27  ;;  %1463 = vrot.lane.b32.xlu1 %v3136_v48, %s2744_s29  ;;  %v1545_v28 = vmul.f32 %v1534_v17, %v3142_v49  ;;  %v1543_v30 = vmul.f32 %v1526_v18, %v3136_v48 }
 0x1e9   : > { %v1544_v16 = vmul.f32 %v1530_v7, %v1263_v52  ;;  %v1546_v37 = vmul.f32 %v1538_v22, %v3167_v53  ;;  %v1426_v22 = vrot.slane %v3254_v46, %v3029_v11 }
 0x1ec   : > { %1569 = vrot.lane.b32.xlu0 %v3142_v49, %s2745_s27  ;;  %1467 = vrot.lane.b32.xlu1 %v3142_v49, %s2744_s29 }
 0x1f0   : > { %1888 = vrot.lane.b32.xlu0 %v3136_v48, %s2750_s20  ;;  %1273 = vrot.lane.b32.xlu1 %v3136_v48, %s2746_s19 }
 0x1f4   : > { %1892 = vrot.lane.b32.xlu0 %v3142_v49, %s2750_s20  ;;  %1277 = vrot.lane.b32.xlu1 %v3142_v49, %s2746_s19 }
 0x1f8   : > { %1949 = vrot.lane.b32.xlu0 %v3136_v48, %s2751_s8  ;;  %1334 = vrot.lane.b32.xlu1 %v3136_v48, %s2748_s10 }
 0x1fc   : > { %1953 = vrot.lane.b32.xlu0 %v3142_v49, %s2751_s8  ;;  %1338 = vrot.lane.b32.xlu1 %v3142_v49, %s2748_s10 }
 0x200   : > { %1465 = vrot.lane.b32.xlu0 %v1263_v52, %s2744_s29  ;;  %1395 = vrot.lane.b32.xlu1 %v3136_v48, %s2749_s11 }
 0x204   : > { %1267 = vrot.lane.b32.xlu0 %v3167_v53, %s2746_s19  ;;  %1399 = vrot.lane.b32.xlu1 %v3142_v49, %s2749_s11 }
 0x208   : > { %1275 = vrot.lane.b32.xlu0 %v1263_v52, %s2746_s19  ;;  %1460 = vrot.lane.b32.xlu1 %v3167_v53, %s2744_s29 }
 0x20c   : > { %1331 = vrot.lane.b32.xlu0 %v3167_v53, %s2748_s10  ;;  %1567 = vrot.lane.b32.xlu1 %v1263_v52, %s2745_s27 }
 0x210   : > { %1336 = vrot.lane.b32.xlu0 %v1263_v52, %s2748_s10  ;;  %1571 = vrot.lane.b32.xlu1 %v3167_v53, %s2745_s27  ;;  %s3400_s27 = scalar_lea.hbm %s3450_s6, %s2488_s7 }
 0x214   : > { %1392 = vrot.lane.b32.xlu0 %v3167_v53, %s2749_s11  ;;  %1890 = vrot.lane.b32.xlu1 %v1263_v52, %s2750_s20 }
 0x218   : > { %1397 = vrot.lane.b32.xlu0 %v1263_v52, %s2749_s11  ;;  %1894 = vrot.lane.b32.xlu1 %v3167_v53, %s2750_s20 }
 0x21c   : > { %2010 = vrot.lane.b32.xlu0 %v3136_v48, %s2752_s15  ;;  %1951 = vrot.lane.b32.xlu1 %v1263_v52, %s2751_s8  ;;  %v1365_v48 = vrot.slane %v3245_v36, %v3029_v11 }
 0x220   : > { %2014 = vrot.lane.b32.xlu0 %v3142_v49, %s2752_s15  ;;  %1955 = vrot.lane.b32.xlu1 %v3167_v53, %s2751_s8  ;;  %v1357_v49 = vrot.slane %v3245_v36, %v3027_v10 }
 0x224   : > { %2213 = vperm.xlu0 %2605, %v2210_v54   ;;  %2012 = vrot.lane.b32.xlu1 %v1263_v52, %s2752_s15 }
 0x228   : > { %2016 = vrot.lane.b32.xlu1 %v3167_v53, %s2752_s15 }
 0x25a   : > { %v3201_v55 = vpop.permute.xlu0 %1565  ;;  %v1464_v56 = vpop.permute.xlu1 %1463 }
 0x25e   : > { %v3203_v57 = vpop.permute.xlu0 %1569  ;;  %v1468_v58 = vpop.permute.xlu1 %1467 }
 0x262   : > { %v3205_v59 = vpop.permute.xlu0 %1888  ;;  %v3207_v60 = vpop.permute.xlu1 %1273 }
 0x266   : > { %v3209_v61 = vpop.permute.xlu0 %1892  ;;  %v3211_v62 = vpop.permute.xlu1 %1277 }
 0x26a   : > { %v3213_v63 = vpop.permute.xlu0 %1949  ;;  %v3215_v0 = vpop.permute.xlu1 %1334 }
 0x26e   : > { %v3217_v3 = vpop.permute.xlu0 %1953  ;;  %v3219_v5 = vpop.permute.xlu1 %1338 }
 0x272   : > { %v1466_v12 = vpop.permute.xlu0 %1465  ;;  %v3223_v13 = vpop.permute.xlu1 %1395 }
 0x273   : > { %v1469_v14 = vsel %vm498_vm0, %v1464_v56, %v1466_v12  ;;  %v1470_v29 = vsel %vm498_vm0, %v1466_v12, %v1468_v58  ;;  %v1414_v12 = vrot.slane %v3254_v46, %v3025_v9 }
 0x274   : > { %v1500_v15 = vmul.f32 %v1486_v6, %v1469_v14  ;;  %v1501_v42 = vmul.f32 %v1490_v24, %v1470_v29  ;;  %v1910_v24 = vrot.slane %v3266_v1, %v3025_v9 }
 0x276   : > { %v1268_v19 = vpop.permute.xlu0 %1267  ;;  %v3228_v20 = vpop.permute.xlu1 %1399  ;;  %v2514_v21 = vpack.c.bf16 %v1544_v16, %v1500_v15  ;;  %v2515_v14 = vpack.c.bf16 %v1545_v28, %v1501_v42 }
 0x277   : > { %v1281_v18 = vsel %vm303_vm5, %v3211_v62, %v1268_v19 }
 0x278   : > { %1679 = vmatprep.subr.bf16.mxu0 %v2514_v21  ;;  %v1286_v21 = vsel %vm303_vm5, %v1268_v19, %v3207_v60 }
 0x27a   : > { %v1276_v34 = vpop.permute.xlu0 %1275  ;;  %v1461_v35 = vpop.permute.xlu1 %1460 }
 0x27b   : > { %v1471_v39 = vsel %vm498_vm0, %v1468_v58, %v1461_v35  ;;  %v1476_v40 = vsel %vm498_vm0, %v1461_v35, %v1464_v56  ;;  %v1595_v56 = vrot.slane %v1582_v27, %v3023_v8  ;;  %v1599_v58 = vrot.slane %v1582_v27, %v3029_v11 }
 0x27c   : > { %v1499_v43 = vmul.f32 %v1482_v25, %v1476_v40  ;;  %v1502_v44 = vmul.f32 %v1494_v26, %v1471_v39  ;;  %v1279_v2 = vsel %vm303_vm5, %v3207_v60, %v1276_v34 }
 0x27d   : > { %v1310_v25 = vmul.f32 %v1296_v33, %v1279_v2 }
 0x27e   : > { %v2513_v51 = vpack.c.bf16 %v1543_v30, %v1499_v43  ;;  %v1332_v52 = vpop.permute.xlu0 %1331  ;;  %v1568_v53 = vpop.permute.xlu1 %1567  ;;  %v2516_v54 = vpack.c.bf16 %v1546_v37, %v1502_v44 }
 0x27f   : > { %v1573_v6 = vsel %vm605_vm1, %v3201_v55, %v1568_v53  ;;  %v1574_v7 = vsel %vm605_vm1, %v1568_v53, %v3203_v57  ;;  %v1347_v15 = vsel %vm365_vm4, %v1332_v52, %v3215_v0  ;;  %v1342_v26 = vsel %vm365_vm4, %v3219_v5, %v1332_v52 }
 0x280   : > { %v1604_v16 = vmul.f32 %v1587_v41, %v1573_v6  ;;  %v1605_v17 = vmul.f32 %v1591_v45, %v1574_v7  ;;  %1680 = vmatpush1.bf16.msra.mxu0 %v2513_v51  ;;  %1720 = vmatprep.subr.bf16.mxu1 %v2516_v54  ;;  %v1370_v35 = vmul.f32 %v1353_v47, %v1347_v15 }
 0x281   : > { %1721 = vmatpush1.bf16.msra.mxu1 %v2515_v14  ;;  %v1309_v41 = vmul.f32 %v1292_v31, %v1286_v21  ;;  %v1373_v42 = vmul.f32 %v1365_v48, %v1342_v26  ;;  %v1312_v31 = vmul.f32 %v1304_v32, %v1281_v18  ;;  %v1418_v54 = vrot.slane %v3254_v46, %v3027_v10 }
 0x282   : > { %v2517_v27 = vpack.c.bf16 %v1604_v16, %v1604_v16  ;;  %v2518_v28 = vpack.c.bf16 %v1605_v17, %v1605_v17  ;;  %v1337_v29 = vpop.permute.xlu0 %1336  ;;  %v1572_v30 = vpop.permute.xlu1 %1571  ;;  %v1918_v7 = vrot.slane %v3266_v1, %v3023_v8  ;;  %v1922_v26 = vrot.slane %v3266_v1, %v3029_v11 }
 0x283   : > { %v1340_v60 = vsel %vm365_vm4, %v3215_v0, %v1337_v29  ;;  %v1575_v19 = vsel %vm605_vm1, %v3203_v57, %v1572_v30  ;;  %v1581_v36 = vsel %vm605_vm1, %v1572_v30, %v3201_v55  ;;  %v1341_v33 = vsel %vm365_vm4, %v1337_v29, %v3219_v5 }
 0x284   : > { %v1371_v37 = vmul.f32 %v1357_v49, %v1340_v60  ;;  %v1606_v39 = vmul.f32 %v1595_v56, %v1575_v19  ;;  %v1607_v40 = vmul.f32 %v1599_v58, %v1581_v36  ;;  %2411 = vmatprep.subr.msk.bf16.mxu0 %vm702_vm2, %v2518_v28  ;;  %v1668_v43 = vsel %vm702_vm2, %v2517_v27, 0  ;;  %v2402_v49 = vld [vmem:[%s3448_s4 + $0x4] sm:$0xf] }
 0x285   : > { %v1914_v0 = vrot.slane %v3266_v1, %v3027_v10  ;;  %v1280_v57 = vsel %vm303_vm5, %v1276_v34, %v3211_v62  ;;  %1682 = vmatpush1.bf16.msra.mxu0 %v1668_v43  ;;  %v1372_v48 = vmul.f32 %v1361_v50, %v1341_v33  ;;  %v3312_v34 = vld [vmem:[#allocation6 + $0x7] ss:$8 sm:$0xf]  ;;  %v2521_v52 = vpack.c.bf16 %v1370_v35, %v1309_v41  ;;  %v2027_v1 = vld [vmem:[#allocation6 + $0x20] ss:$8 sm:$0xf] }
 0x286   : > { %v2519_v44 = vpack.c.bf16 %v1606_v39, %v1606_v39  ;;  %v2520_v55 = vpack.c.bf16 %v1607_v40, %v1607_v40  ;;  %v1393_v45 = vpop.permute.xlu0 %1392  ;;  %v1891_v5 = vpop.permute.xlu1 %1890  ;;  %v2522_v47 = vpack.c.bf16 %v1371_v37, %v1310_v25  ;;  %v1422_v56 = vrot.slane %v3254_v46, %v3023_v8  ;;  %v1453_v41 = vld [vmem:[%s3448_s4] sm:$0xf] }
 0x287   : > { %v1403_v51 = vsel %vm428_vm6, %v3228_v20, %v1393_v45  ;;  %v1408_v62 = vsel %vm428_vm6, %v1393_v45, %v3223_v13  ;;  %v1311_v32 = vmul.f32 %v1300_v38, %v1280_v57  ;;  %v2524_v2 = vpack.c.bf16 %v1373_v42, %v1312_v31 }
 0x288   : > { %v1431_v53 = vmul.f32 %v1414_v12, %v1408_v62  ;;  %2413 = vmatprep.subr.msk.bf16.mxu1 %vm702_vm2, %v2520_v55  ;;  %v1434_v50 = vmul.f32 %v1426_v22, %v1403_v51  ;;  %1806 = vmatprep.subr.bf16.mxu0 %v2522_v47  ;;  %v1674_v58 = vsel %vm702_vm2, %v2519_v44, 0  ;;  %v1971_v46 = vrot.slane %v3312_v34, %v3025_v9 }
 0x289   : > { %2412 = vmatmul.mubr.msk.bf16.vlgmr.msra.gmra.mrb[12].mxu0 %vm698_vm3, %v2402_v49  ;;  %1723 = vmatpush1.bf16.msra.mxu1 %v1674_v58  ;;  %v1975_v23 = vrot.slane %v3312_v34, %v3027_v10  ;;  %v2523_v38 = vpack.c.bf16 %v1372_v48, %v1311_v32  ;;  %v1896_v14 = vsel %vm932_vm8, %v3205_v59, %v1891_v5 }
 0x28a   : > { %1807 = vmatpush1.bf16.msra.mxu0 %v2521_v52  ;;  %v1398_v6 = vpop.permute.xlu0 %1397  ;;  %v1895_v12 = vpop.permute.xlu1 %1894  ;;  %1847 = vmatprep.subr.bf16.mxu1 %v2524_v2  ;;  %v2525_v17 = vpack.c.bf16 %v1431_v53, %v1431_v53  ;;  %v1897_v18 = vsel %vm932_vm8, %v1891_v5, %v3209_v61  ;;  %v2528_v25 = vpack.c.bf16 %v1434_v50, %v1434_v50 }
 0x28b   : > { %v1401_v15 = vsel %vm428_vm6, %v3223_v13, %v1398_v6  ;;  %v1402_v16 = vsel %vm428_vm6, %v1398_v6, %v3228_v20  ;;  %1838 = vmatprep.mubr.bf16.mxu0 %v2747_v4  ;;  %v1979_v13 = vrot.slane %v3312_v34, %v3023_v8  ;;  %v1983_v20 = vrot.slane %v3312_v34, %v3029_v11 }
 0x28c   : > { %v1432_v21 = vmul.f32 %v1418_v54, %v1401_v15  ;;  %v1433_v22 = vmul.f32 %v1422_v56, %v1402_v16  ;;  %2414 = vmatmul.mubr.msk.bf16.vlgmr.msra.gmra.mrb[12].mxu1 %vm698_vm3, %v2402_v49  ;;  %v1927_v27 = vmul.f32 %v1910_v24, %v1896_v14  ;;  %v1928_v35 = vmul.f32 %v1914_v0, %v1897_v18 }
 0x28d   : > { %1848 = vmatpush1.bf16.msra.mxu1 %v2523_v38  ;;  %1879 = vmatprep.mubr.bf16.mxu1 %v2747_v4  ;;  %v1898_v60 = vsel %vm932_vm8, %v3209_v61, %v1895_v12  ;;  %v1795_v39 = vsel %vm702_vm2, %v2525_v17, 0  ;;  %v1904_v61 = vsel %vm932_vm8, %v1895_v12, %v3205_v59  ;;  %v2032_v57 = vrot.slane %v2027_v1, %v3025_v9 }
 0x28e   : > { %v2526_v28 = vpack.c.bf16 %v1432_v21, %v1432_v21  ;;  %v2527_v29 = vpack.c.bf16 %v1433_v22, %v1433_v22  ;;  %v1952_v30 = vpop.permute.xlu1 %1951  ;;  %2425 = vmatprep.subr.msk.bf16.mxu1 %vm702_vm2, %v2528_v25  ;;  %v2011_v24 = vpop.permute.xlu0 %2010  ;;  %v1929_v44 = vmul.f32 %v1918_v7, %v1898_v60  ;;  %v2036_v59 = vrot.slane %v2027_v1, %v3027_v10 }
 0x28f   : > { %v1957_v19 = vsel %vm995_vm7, %v3213_v63, %v1952_v30  ;;  %v1958_v36 = vsel %vm995_vm7, %v1952_v30, %v3217_v3  ;;  %v1930_v5 = vmul.f32 %v1922_v26, %v1904_v61  ;;  %v2040_v34 = vrot.slane %v2027_v1, %v3023_v8  ;;  %v2433_v8 = vld [vmem:[%s3448_s4 + $0x8] sm:$0xf] }
 0x290   : > { %v1988_v33 = vmul.f32 %v1971_v46, %v1957_v19  ;;  %v1989_v37 = vmul.f32 %v1975_v23, %v1958_v36  ;;  %2423 = vmatprep.subr.msk.bf16.mxu0 %vm702_vm2, %v2526_v28  ;;  %v1801_v40 = vsel %vm702_vm2, %v2527_v29, 0  ;;  %v2044_v52 = vrot.slane %v2027_v1, %v3029_v11 }
 0x291   : > { %1809 = vmatpush1.bf16.msra.mxu0 %v1795_v39  ;;  %1850 = vmatpush1.bf16.msra.mxu1 %v1801_v40 }
 0x292   : > { %v2529_v42 = vpack.c.bf16 %v1988_v33, %v1927_v27  ;;  %v1956_v43 = vpop.permute.xlu1 %1955  ;;  %v2530_v0 = vpack.c.bf16 %v1989_v37, %v1928_v35  ;;  %v2015_v31 = vpop.permute.xlu0 %2014 }
 0x293   : > { %v1959_v55 = vsel %vm995_vm7, %v3217_v3, %v1956_v43  ;;  %v1965_v45 = vsel %vm995_vm7, %v1956_v43, %v3213_v63 }
 0x294   : > { %v1990_v47 = vmul.f32 %v1979_v13, %v1959_v55  ;;  %v1991_v49 = vmul.f32 %v1983_v20, %v1965_v45  ;;  %2424 = vmatmul.mubr.msk.bf16.vlgmr.msra.gmra.mrb[16].mxu0 %vm698_vm3, %v1453_v41  ;;  %2124 = vmatprep.subr.bf16.mxu0 %v2530_v0 }
 0x295   : > { %2426 = vmatmul.mubr.msk.bf16.vlgmr.msra.gmra.mrb[16].mxu1 %vm698_vm3, %v1453_v41  ;;  %2125 = vmatpush1.bf16.msra.mxu0 %v2529_v42  ;;  %v2606_v41 = vld [vmem:[%s2931_s17] sm:$0xff] }
 0x296   : > { %v2531_v9 = vpack.c.bf16 %v1990_v47, %v1929_v44  ;;  %v2013_v48 = vpop.permute.xlu1 %2012  ;;  %v2532_v51 = vpack.c.bf16 %v1991_v49, %v1930_v5  ;;  %2156 = vmatprep.mubr.bf16.mxu0 %v2747_v4  ;;  %2197 = vmatprep.mubr.bf16.mxu1 %v2747_v4  ;;  %v2608_v49 = vld [vmem:[%s2931_s17 + $0x10] sm:$0xff] }
 0x297   : > { %v2018_v63 = vsel %vm1058_vm9, %v2011_v24, %v2013_v48  ;;  %v2019_v10 = vsel %vm1058_vm9, %v2013_v48, %v2015_v31 }
 0x298   : > { %v2049_v3 = vmul.f32 %v2032_v57, %v2018_v63  ;;  %v2050_v62 = vmul.f32 %v2036_v59, %v2019_v10  ;;  %2165 = vmatprep.subr.bf16.mxu1 %v2532_v51  ;;  %v2607_v57 = vld [vmem:[%s2931_s17 + $0x8] sm:$0xff] }
 0x299   : > { %2166 = vmatpush1.bf16.msra.mxu1 %v2531_v9  ;;  %v2609_v9 = vld [vmem:[%s2931_s17 + $0x18] sm:$0xff]  ;;  %s2753_s17 = smov [#allocation8]  }
 0x29a   : > { %v2533_v53 = vpack.c.bf16 %v2049_v3, %v2049_v3  ;;  %v2534_v54 = vpack.c.bf16 %v2050_v62, %v2050_v62  ;;  %v2017_v56 = vpop.permute.xlu1 %2016  ;;  %s2672_s19 = sshll.u32 %s2753_s17, 4  ;;  %s2673_s19 = int_to_ptr.vmem [resolvable:$false] %s2672_s19 }
 0x29b   : > { %v2020_v32 = vsel %vm1058_vm9, %v2015_v31, %v2017_v56  ;;  %v2026_v50 = vsel %vm1058_vm9, %v2017_v56, %v2011_v24  ;;  %s2674_s10 = scalar_lea.vmem %s2673_s19, 1024  ;;  %p2675_p10 = scmp.lt.s32.totalorder %s3402_s30, %s2673_s19 }
 0x29c   : > { %v2051_v4 = vmul.f32 %v2040_v34, %v2020_v32  ;;  %v2052_v58 = vmul.f32 %v2044_v52, %v2026_v50  ;;  %2442 = vmatprep.subr.msk.bf16.mxu0 %vm702_vm2, %v2534_v54  ;;  %v2113_v2 = vsel %vm702_vm2, %v2533_v53, 0  ;;  %p2676_p13 = scmp.lt.s32.totalorder %s2674_s10, %s2668_s12 }
 0x29d   : > { %2127 = vmatpush1.bf16.msra.mxu0 %v2113_v2 }
 0x29e   : > { %v2535_v11 = vpack.c.bf16 %v2051_v4, %v2051_v4  ;;  %v2536_v6 = vpack.c.bf16 %v2052_v58, %v2052_v58  ;;  %p2677_p3 = por %p2676_p13, %p2675_p10 }
 0x2a0   : > { %2443 = vmatmul.mubr.msk.bf16.vlgmr.msra.gmra.mrb[20].mxu0 %vm698_vm3, %v2433_v8  ;;  %2444 = vmatprep.subr.msk.bf16.mxu1 %vm702_vm2, %v2536_v6  ;;  %v2119_v7 = vsel %vm702_vm2, %v2535_v11, 0  ;;  %p2678_p7 = pnand %p2677_p3, %p2671_p8 }
 0x2a1   : > { %2168 = vmatpush1.bf16.msra.mxu1 %v2119_v7 }
 0x2a3   : > { %v2214_v1 = vpop.permute.xlu0 %2213 }
 0x2a4   : > { %2445 = vmatmul.mubr.msk.bf16.vlgmr.msra.gmra.mrb[20].mxu1 %vm698_vm3, %v2433_v8 }
 0x35c   : > { %v1713_v12 = vpop.f32.mrb[12].mxu0 }
 0x35d   : > { %v1715_v46 = vpop.f32.mrb[13].mxu0 }
 0x35e   : > { %v1717_v23 = vpop.f32.mrb[14].mxu0 }
 0x35f   : > { %v1718_v38 = vpop.f32.mrb[15].mxu0  ;;  %v1754_v14 = vpop.f32.mrb[12].mxu1 }
 0x360   : > { %v1756_v15 = vpop.f32.mrb[13].mxu1 }
 0x361   : > { %v1758_v16 = vpop.f32.mrb[14].mxu1 }
 0x362   : > { %v1759_v17 = vpop.f32.mrb[15].mxu1 }
 0x367   : > { %v1840_v18 = vpop.f32.mrb[16].mxu0 }
 0x368   : > { %v1841_v21 = vadd.f32 %v1840_v18, %v1713_v12  ;;  %v1881_v22 = vpop.f32.mrb[16].mxu1  ;;  %v1842_v25 = vpop.f32.mrb[17].mxu0 }
 0x369   : > { %v1882_v26 = vadd.f32 %v1881_v22, %v1754_v14  ;;  %v1843_v13 = vadd.f32 %v1842_v25, %v1715_v46  ;;  %v1883_v20 = vpop.f32.mrb[17].mxu1  ;;  %v1844_v27 = vpop.f32.mrb[18].mxu0 }
 0x36a   : > { %v1884_v28 = vadd.f32 %v1883_v20, %v1756_v15  ;;  %v1885_v29 = vpop.f32.mrb[18].mxu1  ;;  %v1845_v30 = vpop.f32.mrb[19].mxu0 }
 0x36b   : > { %v1886_v35 = vpop.f32.mrb[19].mxu1 }
 0x373   : > { %v2158_v60 = vpop.f32.mrb[20].mxu0 }
 0x374   : > { %v2206_v19 = vadd.f32 %v2158_v60, %v1841_v21  ;;  %v2160_v36 = vpop.f32.mrb[21].mxu0 }
 0x375   : > { %v2207_v24 = vadd.f32 %v2160_v36, %v1843_v13  ;;  %v2162_v33 = vpop.f32.mrb[22].mxu0 }
 0x376   : > { %v2216_v37 = vadd.f32 %v2214_v1, %v2206_v19  ;;  %v2163_v39 = vpop.f32.mrb[23].mxu0 }
 0x377   : > { %v2217_v40 = vadd.f32 %v2214_v1, %v2207_v24  ;;  %v2199_v61 = vpop.f32.mrb[20].mxu1 }
 0x378   : > { %v2220_v42 = vadd.f32 %v2606_v41, %v2216_v37  ;;  %v2208_v43 = vadd.f32 %v2199_v61, %v1882_v26  ;;  %v2201_v0 = vpop.f32.mrb[21].mxu1 }
 0x379   : > { %v2221_v44 = vadd.f32 %v2607_v57, %v2217_v40  ;;  %v2209_v55 = vadd.f32 %v2201_v0, %v1884_v28  ;;  %v2203_v45 = vpop.f32.mrb[22].mxu1 }
 0x37a   : > { %2224 = vst [vmem:[%s282_s18] sm:$0xff] %v2220_v42  ;;  %v2218_v59 = vadd.f32 %v2214_v1, %v2208_v43  ;;  %v2204_v5 = vpop.f32.mrb[23].mxu1 }
 0x37b   : > { %2225 = vst [vmem:[%s282_s18 + $0x8] sm:$0xff] %v2221_v44  ;;  %v2219_v47 = vadd.f32 %v2214_v1, %v2209_v55 }
 0x37c   : > { %v2222_v31 = vadd.f32 %v2608_v49, %v2218_v59 }
 0x37d   : > { %v2223_v48 = vadd.f32 %v2609_v9, %v2219_v47 }
 0x37e   : > { %2226 = vst [vmem:[%s282_s18 + $0x10] sm:$0xff] %v2222_v31 }
 0x37f   : > { %2227 = vst [vmem:[%s282_s18 + $0x18] sm:$0xff] %v2223_v48 }
 0x380   : > { %2681 = shalt.err (!%p2678_p7)
}
 0x381   : > { %s2682_s26 = scalar_lea.hbm %s3400_s27, 512  ;;  %s2686_s8 = scalar_lea.hbm %s3450_s6, 1024 }
 0x382   : > { %p2683_p9 = scmp.ne.s32.totalorder %s3400_s27, %s2682_s26  ;;  %p2687_p0 = scmp.lt.u32.totalorder %s3400_s27, %s3450_s6 }
 0x383   : > { %p2688_p11 = scmp.lt.u32.totalorder %s2686_s8, %s2682_s26  ;;  %p2690_p4 = scmp.lt.u32.totalorder %s2682_s26, %s3400_s27 }
 0x384   : > { %p2684_p2 = pnand %p2683_p9, %p2880_p12 }
 0x385   : > { %p2689_p1 = por %p2688_p11, %p2687_p0 }
 0x386   : > { %p2685_p5 = pneg %p2684_p2 }
 0x387   : > { %p2691_p6 = por %p2690_p4, %p2689_p1 }
 0x389   : > { %p2692_p8 = pnand %p2691_p6, %p2685_p5 }
 0x38b   : > { %2695 = shalt.err (!%p2692_p8)
}
 0x38c   : > { %2543 = dma.vmem_to_hbm [thread:$0]  (%p2880_p12), %s3402_s30, 512, %s3400_s27, %s2229_s25  }
 0x38d PF: > { %s2255_s7 = sand.u32 1, %s2726_s21   ;;  %p3465_p10 = scmp.ne.s32.totalorder %s3455_s28, 0 }
 0x38e   : > { %p3466_p13 = scmp.ge.s32.totalorder %s2738_s24, 2  ;;  %s2256_s16 = scalar_lea.sflag [#allocation5], %s2255_s7 }
 0x390   : > { %p2554_p3 = pnand %p3466_p13, %p3465_p10 }
 0x392   : > { %2721 = dma.done.wait (!%p2554_p3), %s2256_s16, 512  }
 0x393   : > { %2723 = vsyncadd (!%p2554_p3), %s2256_s16, 4294966784  ;;  %p20_p7 = scmp.ge.s32.totalorder %s2845_s9, 4   ;;  %s3467_s21 = smov %s2730_s22 }
 0x394   : > { %s3468_s22 = smov %s2734_s23  ;;  %s3469_s23 = smov %s2876_s13 }
 0x395   : > { %s3470_s24 = smov %s2845_s9  ;;  %22 = sbr.rel (!%p20_p7) target bundleno = 6 (0x6), region = 105 }
 0x39c   :  { %2261 = vsyncpa [#allocation4], 1 }
 0x39d   :  { %2263 = vsyncpa [#allocation4 + $0x1], 1 }
 0x39e   :  { %2264 = vsyncpa [#allocation7], 1 }
 0x39f   :  { %2265 = vsyncpa [#allocation5], 1 }
 0x3a0   :  { %2267 = vsyncpa [#allocation5 + $0x1], 1 }

</bundles_post_ra>
